<compile_context>
chip_gen: v7x
topology: tpu7x:2x2x1
jax: 0.10.0
libtpu: 0.0.40
codegen_flags: <defaults>
</compile_context>

<pallas_src>
import jax
import jax.numpy as jnp
from jax import lax
from jax.experimental import pallas as pl
from jax.experimental.pallas import tpu as pltpu

# ----- config (matches the PyTorch module hyper-parameters) -----
B = 2                        # batch
L = 4                        # sequence length (dense vector repeated L times)
DENSE = 16                   # dense_size (LSTM input size)
CONV_IN_SHAPE = (4, 4, 8)    # (C, H, W); rnn_hidden_size = C*H*W = 128
DEPTH = 2                    # number of ERPDecLayer blocks
SUBLAYERS = 2                # conv_sublayers per block
BN_EPS = 1e-5

C0, HC, WC = CONV_IN_SHAPE
HIDDEN = C0 * HC * WC        # 128
N_IMG = B * L                # 8 images flow through the conv stack together
CMAX = 2 * C0                # max channel count anywhere in the conv stack (8)
LANES = CMAX * N_IMG         # 64: conv activation lane index = c*N_IMG + n
NUM_SUB = DEPTH * SUBLAYERS  # 4 conv sublayers total
HW = HC * WC                 # 32 spatial positions


# ---------------------------------------------------------------------------
# Fused kernel body (one grid step = one conv sublayer; LSTM at step 0,
# reconstruct at the last step).
# ---------------------------------------------------------------------------
def erp_decoder_kernel(x_ref, wih_t_ref, whh_t_ref, blstm_ref,
                       wconv_ref, shift_ref, recw_ref, recb_ref,
                       out_ref, xpad_ref):
    # x_ref      : (B, DENSE)
    # wih_t_ref  : (DENSE, 4*HIDDEN)          weight_ih_l0^T
    # whh_t_ref  : (HIDDEN, 4*HIDDEN)         weight_hh_l0^T
    # blstm_ref  : (1, 4*HIDDEN)              bias_ih + bias_hh
    # wconv_ref  : (1, 9, LANES, LANES)       this sublayer's BN-folded block-diag weights
    # shift_ref  : (1, 1, LANES)              folded conv-bias + BN shift
    # recw_ref   : (LANES, N_IMG)             1x1 reconstruct weights (block-diag over images)
    # recb_ref   : (1, 1) SMEM                reconstruct bias
    # out_ref    : (HW, N_IMG)                lane-dense output, column n = l*B + b
    # xpad_ref   : (HC+2, WC+2, LANES)        persistent zero-padded activation scratch
    s = pl.program_id(0)

    # ---------------- step 0: LSTM (lane-dense) + seed the conv scratch -----
    @pl.when(s == 0)
    def _lstm_and_seed():
        # Zero the padded scratch once; its border ring supplies the 'same'
        # zero padding for every conv sublayer (writebacks only touch the
        # interior, so the border stays zero across grid steps).
        xpad_ref[...] = jnp.zeros_like(xpad_ref)

        # The dense input is repeated at every time step, so the input-to-
        # hidden contribution is computed once.  Gates live as (B, 4H):
        # lane-dense nonlinearities, aligned 128-lane gate slices.
        xg = jnp.dot(x_ref[...], wih_t_ref[...],
                     preferred_element_type=jnp.float32) + blstm_ref[...]   # (B, 4H)
        h = jnp.zeros((B, HIDDEN), jnp.float32)
        c = jnp.zeros((B, HIDDEN), jnp.float32)
        hs = []
        for l in range(L):                                     # fully unrolled
            if l == 0:
                gates = xg                                     # h0 == 0
            else:
                gates = xg + jnp.dot(h, whh_t_ref[...],
                                     preferred_element_type=jnp.float32)
            # PyTorch gate order: i, f, g, o
            i = jax.nn.sigmoid(gates[:, 0 * HIDDEN:1 * HIDDEN])
            f = jax.nn.sigmoid(gates[:, 1 * HIDDEN:2 * HIDDEN])
            g = jnp.tanh(gates[:, 2 * HIDDEN:3 * HIDDEN])
            o = jax.nn.sigmoid(gates[:, 3 * HIDDEN:4 * HIDDEN])
            c = f * c + i * g
            h = o * jnp.tanh(c)
            hs.append(h)

        # (L*B, HIDDEN): row n = l*B + b.  One transpose + 4 coarse stores
        # replaces the previous 16 two-lane masked scatter stores.
        h_seq = jnp.concatenate(hs, axis=0)                    # (N_IMG, HIDDEN)
        h_t = h_seq.T                                          # (HIDDEN, N_IMG)
        for ch in range(C0):
            blk = h_t[ch * HW:(ch + 1) * HW, :]                # (HW, N_IMG)
            xpad_ref[1:1 + HC, 1:1 + WC, ch * N_IMG:(ch + 1) * N_IMG] = (
                blk.reshape(HC, WC, N_IMG))

    # ---------------- conv sublayer s: 9 accumulated matmuls ----------------
    # Activations pack (channel, image) into the lane dim; each sublayer is a
    # sum over the 9 kernel taps of (HW, LANES) @ (LANES, LANES) matmuls with
    # image-block-diagonal, BN-folded weights.  Only 3 dx-shifted window loads
    # per sublayer; dy variants are leading-dim slices of the loaded value.
    acc = jnp.zeros((HW, LANES), jnp.float32)
    for dx in range(3):
        cols = xpad_ref[:, dx:dx + WC, :]                      # (HC+2, WC, LANES)
        for dy in range(3):
            win = cols[dy:dy + HC]                             # (HC, WC, LANES)
            acc = acc + jnp.dot(win.reshape(HW, LANES),
                                wconv_ref[0, dy * 3 + dx],
                                preferred_element_type=jnp.float32)
    y = acc + shift_ref[0]                                     # conv bias + BN shift
    y = jnp.where(y > 0, y, 0.1 * y)                           # LeakyReLU(0.1)
    xpad_ref[1:1 + HC, 1:1 + WC, :] = y.reshape(HC, WC, LANES)

    # ---------------- last step: 1x1 reconstruct, lane-dense output ---------
    @pl.when(s == NUM_SUB - 1)
    def _reconstruct():
        rec = jnp.dot(y, recw_ref[...], preferred_element_type=jnp.float32)
        out_ref[...] = rec + recb_ref[0, 0]                    # (HW, N_IMG)


def erp_decoder_forward(x, kp):
    """Full ERPDecoder forward: one fused pallas_call + trivial wrapper reshape."""
    rec = pl.pallas_call(
        erp_decoder_kernel,
        out_shape=jax.ShapeDtypeStruct((HW, N_IMG), jnp.float32),
        grid_spec=pltpu.PrefetchScalarGridSpec(
            num_scalar_prefetch=0,
            grid=(NUM_SUB,),
            in_specs=[
                pl.BlockSpec((B, DENSE), lambda s: (0, 0)),
                pl.BlockSpec((DENSE, 4 * HIDDEN), lambda s: (0, 0)),
                pl.BlockSpec((HIDDEN, 4 * HIDDEN), lambda s: (0, 0)),
                pl.BlockSpec((1, 4 * HIDDEN), lambda s: (0, 0)),
                # per-sublayer weight tile, prefetched while step s-1 computes
                pl.BlockSpec((1, 9, LANES, LANES), lambda s: (s, 0, 0, 0)),
                pl.BlockSpec((1, 1, LANES), lambda s: (s, 0, 0)),
                pl.BlockSpec((LANES, N_IMG), lambda s: (0, 0)),
                pl.BlockSpec((1, 1), lambda s: (0, 0),
                             memory_space=pltpu.MemorySpace.SMEM),
            ],
            out_specs=pl.BlockSpec((HW, N_IMG), lambda s: (0, 0)),
            scratch_shapes=[pltpu.VMEM((HC + 2, WC + 2, LANES), jnp.float32)],
        ),
        compiler_params=pltpu.CompilerParams(
            dimension_semantics=("arbitrary",)),
        cost_estimate=pl.CostEstimate(flops=6_000_000, transcendentals=5_000,
                                      bytes_accessed=900_000),
    )(x, kp['wih_t'], kp['whh_t'], kp['b_lstm'],
      kp['w_conv'], kp['shift_conv'], kp['rec_w'], kp['rec_b'])
    # Kernel output column n = l*B + b  ->  (B, H*W, L) via cheap XLA plumbing.
    return jnp.transpose(rec.reshape(HW, L, B), (2, 0, 1))


# ---------------------------------------------------------------------------
# Deterministic raw parameters in PyTorch layouts (shapes follow __init__).
# ---------------------------------------------------------------------------
def init_params(key):
    def take(shape, scale=0.1):
        nonlocal key
        key, sub = jax.random.split(key)
        return scale * jax.random.normal(sub, shape, jnp.float32)

    params = {}
    params['wih'] = take((4 * HIDDEN, DENSE))
    params['whh'] = take((4 * HIDDEN, HIDDEN))
    params['bih'] = take((4 * HIDDEN,))
    params['bhh'] = take((4 * HIDDEN,))

    convs = []
    cnn_chns = C0 * 2
    in_ch = C0
    for _d in range(DEPTH):
        conv_size = cnn_chns
        for s in range(SUBLAYERS):
            if s == 0:
                cin, cout = in_ch, conv_size
            elif s == 1:
                cin, cout = conv_size, conv_size // 2
            else:
                cin, cout = conv_size // 2, conv_size // 2
            convs.append(dict(
                w=take((cout, cin, 3, 3)),          # PyTorch Conv2d layout
                b=take((cout,)),
                gamma=1.0 + take((cout,)),
                beta=take((cout,)),
                mean=jnp.zeros((cout,), jnp.float32),
                var=jnp.ones((cout,), jnp.float32)))
        in_ch = conv_size // 2
        cnn_chns = cnn_chns // 2
    params['convs'] = convs
    params['rec_w'] = take((1, in_ch, 1, 1))        # reconstruct 1x1: in_ch -> 1
    params['rec_b'] = take((1,))
    return params


# ---------------------------------------------------------------------------
# One-time parameter folding / layout for the fused kernel (pure preprocessing).
# ---------------------------------------------------------------------------
def fold_params(p):
    kp = {}
    kp['wih_t'] = p['wih'].T                                  # (DENSE, 4H)
    kp['whh_t'] = p['whh'].T                                  # (HIDDEN, 4H)
    kp['b_lstm'] = (p['bih'] + p['bhh']).reshape(1, 4 * HIDDEN)

    eye_n = jnp.eye(N_IMG, dtype=jnp.float32)
    wbds, shifts = [], []
    for sub in p['convs']:
        w, bias = sub['w'], sub['b']
        cout, cin = w.shape[0], w.shape[1]
        scale = sub['gamma'] / jnp.sqrt(sub['var'] + BN_EPS)            # (cout,)
        shift = scale * (bias - sub['mean']) + sub['beta']              # (cout,)
        eff = w * scale[:, None, None, None]                            # BN folded
        # w9[k, ci, co] = eff[co, ci, dy, dx],  k = dy*3 + dx
        w9 = jnp.transpose(eff, (2, 3, 1, 0)).reshape(9, cin, cout)
        w9p = jnp.zeros((9, CMAX, CMAX), jnp.float32).at[:, :cin, :cout].set(w9)
        # Block-diagonal over the image index n:
        #   Wbd[k, ci*N + n', co*N + n] = delta_{n,n'} * w9p[k, ci, co]
        wbd = jnp.einsum('kio,nm->kinom', w9p, eye_n).reshape(9, LANES, LANES)
        wbds.append(wbd)
        shiftp = jnp.zeros((CMAX,), jnp.float32).at[:cout].set(shift)
        shifts.append(jnp.repeat(shiftp, N_IMG).reshape(1, LANES))
    kp['w_conv'] = jnp.stack(wbds)                  # (NUM_SUB, 9, LANES, LANES)
    kp['shift_conv'] = jnp.stack(shifts)            # (NUM_SUB, 1, LANES)

    rw = p['rec_w'][0, :, 0, 0]                     # (C_final,)
    rwp = jnp.zeros((CMAX,), jnp.float32).at[:rw.shape[0]].set(rw)
    kp['rec_w'] = jnp.einsum('c,nm->cnm', rwp, eye_n).reshape(LANES, N_IMG)
    kp['rec_b'] = p['rec_b'].reshape(1, 1)
    return kp


# ---------------------------------------------------------------------------
# Pure-JAX reference (mirrors the PyTorch forward in eval mode).
# ---------------------------------------------------------------------------
def reference_forward(x, p):
    hp = lax.Precision.HIGHEST
    h = jnp.zeros((B, HIDDEN), jnp.float32)
    c = jnp.zeros((B, HIDDEN), jnp.float32)
    outs = []
    for _ in range(L):
        gates = (jnp.dot(x, p['wih'].T, precision=hp) + p['bih']
                 + jnp.dot(h, p['whh'].T, precision=hp) + p['bhh'])
        i = jax.nn.sigmoid(gates[:, 0 * HIDDEN:1 * HIDDEN])
        f = jax.nn.sigmoid(gates[:, 1 * HIDDEN:2 * HIDDEN])
        g = jnp.tanh(gates[:, 2 * HIDDEN:3 * HIDDEN])
        o = jax.nn.sigmoid(gates[:, 3 * HIDDEN:4 * HIDDEN])
        c = f * c + i * g
        h = o * jnp.tanh(c)
        outs.append(h)
    seq = jnp.stack(outs, axis=1)                   # (B, L, HIDDEN)
    a = seq.reshape(B * L, C0, HC, WC)

    for sub in p['convs']:
        a = lax.conv_general_dilated(
            a, sub['w'], window_strides=(1, 1), padding='SAME',
            dimension_numbers=('NCHW', 'OIHW', 'NCHW'), precision=hp)
        a = a + sub['b'][None, :, None, None]
        scale = sub['gamma'] / jnp.sqrt(sub['var'] + BN_EPS)
        a = (scale[None, :, None, None] * (a - sub['mean'][None, :, None, None])
             + sub['beta'][None, :, None, None])
        a = jnp.where(a > 0, a, 0.1 * a)            # LeakyReLU(0.1)

    a = lax.conv_general_dilated(
        a, p['rec_w'], window_strides=(1, 1), padding='SAME',
        dimension_numbers=('NCHW', 'OIHW', 'NCHW'), precision=hp)
    a = a + p['rec_b'][None, :, None, None]
    a = a[:, 0]                                     # (B*L, H, W)
    a = a.reshape(B, L, HW)
    return jnp.transpose(a, (0, 2, 1))              # (B, H*W, L)


if __name__ == "__main__":
    root = jax.random.PRNGKey(0)
    pkey, xkey = jax.random.split(root)
    raw_params = init_params(pkey)
    kparams = fold_params(raw_params)
    x = jax.random.normal(xkey, (B, DENSE), jnp.float32)

    fwd = jax.jit(erp_decoder_forward)
    out = jax.block_until_ready(fwd(x, kparams))
    ref = jax.block_until_ready(jax.jit(reference_forward)(x, raw_params))

    assert out.shape == (B, HW, L), out.shape
    assert bool(jnp.all(jnp.isfinite(out)))
    max_err = float(jnp.max(jnp.abs(out - ref)))
    assert max_err < 5e-3, f"kernel/reference mismatch, max abs err={max_err}"
    print("KERNEL_OK")
</pallas_src>

<mosaic_0001>
module attributes {stable_mosaic.version = 11 : i64} {
  func.func @erp_decoder_kernel(%arg0: i32, %arg1: memref<2x16xf32, #tpu.memory_space<vmem>>, %arg2: memref<16x512xf32, #tpu.memory_space<vmem>>, %arg3: memref<128x512xf32, #tpu.memory_space<vmem>>, %arg4: memref<1x512xf32, #tpu.memory_space<vmem>>, %arg5: memref<1x9x64x64xf32, #tpu.memory_space<vmem>>, %arg6: memref<1x1x64xf32, #tpu.memory_space<vmem>>, %arg7: memref<64x8xf32, #tpu.memory_space<vmem>>, %arg8: memref<1x1xf32, #tpu.memory_space<smem>>, %arg9: memref<32x8xf32, #tpu.memory_space<vmem>>, %arg10: memref<6x10x64xf32, #tpu.memory_space<vmem>>) attributes {dimension_semantics = [#tpu.dimension_semantics<arbitrary>], iteration_bounds = array<i64: 4>, scalar_prefetch = 0 : i64, scratch_operands = 1 : i64, tpu.core_type = #tpu.core_type<tc>, window_params = [{pipeline_mode = #tpu.pipeline_mode<synchronous>, transform_indices = @transform_0, window_bounds = array<i64: 2, 16>}, {pipeline_mode = #tpu.pipeline_mode<synchronous>, transform_indices = @transform_1, window_bounds = array<i64: 16, 512>}, {pipeline_mode = #tpu.pipeline_mode<synchronous>, transform_indices = @transform_2, window_bounds = array<i64: 128, 512>}, {pipeline_mode = #tpu.pipeline_mode<synchronous>, transform_indices = @transform_3, window_bounds = array<i64: 1, 512>}, {transform_indices = @transform_4, window_bounds = array<i64: 1, 9, 64, 64>}, {transform_indices = @transform_5, window_bounds = array<i64: 1, 1, 64>}, {pipeline_mode = #tpu.pipeline_mode<synchronous>, transform_indices = @transform_6, window_bounds = array<i64: 64, 8>}, {transform_indices = @transform_7, window_bounds = array<i64: 1, 1>}, {pipeline_mode = #tpu.pipeline_mode<synchronous>, transform_indices = @transform_8, window_bounds = array<i64: 32, 8>}]} {
    %c0_i32 = arith.constant 0 : i32
    %0 = arith.cmpi eq, %arg0, %c0_i32 : i32
    %1 = arith.extui %0 : i1 to i32
    %c0_i32_0 = arith.constant 0 : i32
    %2 = arith.cmpi ne, %1, %c0_i32_0 : i32
    scf.if %2 {
      %cst_55 = arith.constant 0.000000e+00 : f32
      %75 = vector.broadcast %cst_55 : f32 to vector<6x10x64xf32>
      %c0_56 = arith.constant 0 : index
      %c0_57 = arith.constant 0 : index
      %c0_58 = arith.constant 0 : index
      %76 = vector.load %arg10[%c0_56, %c0_57, %c0_58] : memref<6x10x64xf32, #tpu.memory_space<vmem>>, vector<6x10x64xf32>
      tpu.vector_store %arg10[%c0_56, %c0_57, %c0_58], %75 {strides = array<i32>} : memref<6x10x64xf32, #tpu.memory_space<vmem>>, vector<6x10x64xf32>,
      %c0_59 = arith.constant 0 : index
      %c0_60 = arith.constant 0 : index
      %77 = vector.load %arg1[%c0_59, %c0_60] : memref<2x16xf32, #tpu.memory_space<vmem>>, vector<2x16xf32>
      %c0_61 = arith.constant 0 : index
      %c0_62 = arith.constant 0 : index
      %78 = vector.load %arg2[%c0_61, %c0_62] : memref<16x512xf32, #tpu.memory_space<vmem>>, vector<16x512xf32>
      %cst_63 = arith.constant dense<0.000000e+00> : vector<2x512xf32>
      %79 = tpu.matmul %77, %78, %cst_63 {dimension_numbers = #tpu.dot_dimension_numbers<[1], [0], [0], [1], [0, 0, 1, 1], [], []>} : vector<2x16xf32>, vector<16x512xf32>, vector<2x512xf32> -> vector<2x512xf32>
      %c0_64 = arith.constant 0 : index
      %c0_65 = arith.constant 0 : index
      %80 = vector.load %arg4[%c0_64, %c0_65] : memref<1x512xf32, #tpu.memory_space<vmem>>, vector<1x512xf32>
      %81 = vector.broadcast %80 : vector<1x512xf32> to vector<2x512xf32>
      %82 = arith.addf %79, %81 : vector<2x512xf32>
      %cst_66 = arith.constant 0.000000e+00 : f32
      %83 = vector.broadcast %cst_66 : f32 to vector<2x128xf32>
      %84 = vector.extract_strided_slice %82 {offsets = [0, 0], sizes = [2, 128], strides = [1, 1]} : vector<2x512xf32> to vector<2x128xf32>
      %85 = arith.negf %84 : vector<2x128xf32>
      %86 = math.exp %85 : vector<2x128xf32>
      %cst_67 = arith.constant 1.000000e+00 : f32
      %87 = vector.broadcast %cst_67 : f32 to vector<2x128xf32>
      %88 = arith.addf %87, %86 : vector<2x128xf32>
      %89 = arith.divf %87, %88 : vector<2x128xf32>
      %90 = vector.extract_strided_slice %82 {offsets = [0, 128], sizes = [2, 128], strides = [1, 1]} : vector<2x512xf32> to vector<2x128xf32>
      %91 = arith.negf %90 : vector<2x128xf32>
      %92 = math.exp %91 : vector<2x128xf32>
      %cst_68 = arith.constant 1.000000e+00 : f32
      %93 = vector.broadcast %cst_68 : f32 to vector<2x128xf32>
      %94 = arith.addf %93, %92 : vector<2x128xf32>
      %95 = arith.divf %93, %94 : vector<2x128xf32>
      %96 = vector.extract_strided_slice %82 {offsets = [0, 256], sizes = [2, 128], strides = [1, 1]} : vector<2x512xf32> to vector<2x128xf32>
      %97 = math.tanh %96 : vector<2x128xf32>
      %98 = vector.extract_strided_slice %82 {offsets = [0, 384], sizes = [2, 128], strides = [1, 1]} : vector<2x512xf32> to vector<2x128xf32>
      %99 = arith.negf %98 : vector<2x128xf32>
      %100 = math.exp %99 : vector<2x128xf32>
      %cst_69 = arith.constant 1.000000e+00 : f32
      %101 = vector.broadcast %cst_69 : f32 to vector<2x128xf32>
      %102 = arith.addf %101, %100 : vector<2x128xf32>
      %103 = arith.divf %101, %102 : vector<2x128xf32>
      %104 = arith.mulf %95, %83 : vector<2x128xf32>
      %105 = arith.mulf %89, %97 : vector<2x128xf32>
      %106 = arith.addf %104, %105 : vector<2x128xf32>
      %107 = math.tanh %106 : vector<2x128xf32>
      %108 = arith.mulf %103, %107 : vector<2x128xf32>
      %c0_70 = arith.constant 0 : index
      %c0_71 = arith.constant 0 : index
      %109 = vector.load %arg3[%c0_70, %c0_71] : memref<128x512xf32, #tpu.memory_space<vmem>>, vector<128x512xf32>
      %cst_72 = arith.constant dense<0.000000e+00> : vector<2x512xf32>
      %110 = tpu.matmul %108, %109, %cst_72 {dimension_numbers = #tpu.dot_dimension_numbers<[1], [0], [0], [1], [0, 0, 1, 1], [], []>} : vector<2x128xf32>, vector<128x512xf32>, vector<2x512xf32> -> vector<2x512xf32>
      %111 = arith.addf %82, %110 : vector<2x512xf32>
      %112 = vector.extract_strided_slice %111 {offsets = [0, 0], sizes = [2, 128], strides = [1, 1]} : vector<2x512xf32> to vector<2x128xf32>
      %113 = arith.negf %112 : vector<2x128xf32>
      %114 = math.exp %113 : vector<2x128xf32>
      %cst_73 = arith.constant 1.000000e+00 : f32
      %115 = vector.broadcast %cst_73 : f32 to vector<2x128xf32>
      %116 = arith.addf %115, %114 : vector<2x128xf32>
      %117 = arith.divf %115, %116 : vector<2x128xf32>
      %118 = vector.extract_strided_slice %111 {offsets = [0, 128], sizes = [2, 128], strides = [1, 1]} : vector<2x512xf32> to vector<2x128xf32>
      %119 = arith.negf %118 : vector<2x128xf32>
      %120 = math.exp %119 : vector<2x128xf32>
      %cst_74 = arith.constant 1.000000e+00 : f32
      %121 = vector.broadcast %cst_74 : f32 to vector<2x128xf32>
      %122 = arith.addf %121, %120 : vector<2x128xf32>
      %123 = arith.divf %121, %122 : vector<2x128xf32>
      %124 = vector.extract_strided_slice %111 {offsets = [0, 256], sizes = [2, 128], strides = [1, 1]} : vector<2x512xf32> to vector<2x128xf32>
      %125 = math.tanh %124 : vector<2x128xf32>
      %126 = vector.extract_strided_slice %111 {offsets = [0, 384], sizes = [2, 128], strides = [1, 1]} : vector<2x512xf32> to vector<2x128xf32>
      %127 = arith.negf %126 : vector<2x128xf32>
      %128 = math.exp %127 : vector<2x128xf32>
      %cst_75 = arith.constant 1.000000e+00 : f32
      %129 = vector.broadcast %cst_75 : f32 to vector<2x128xf32>
      %130 = arith.addf %129, %128 : vector<2x128xf32>
      %131 = arith.divf %129, %130 : vector<2x128xf32>
      %132 = arith.mulf %123, %106 : vector<2x128xf32>
      %133 = arith.mulf %117, %125 : vector<2x128xf32>
      %134 = arith.addf %132, %133 : vector<2x128xf32>
      %135 = math.tanh %134 : vector<2x128xf32>
      %136 = arith.mulf %131, %135 : vector<2x128xf32>
      %c0_76 = arith.constant 0 : index
      %c0_77 = arith.constant 0 : index
      %137 = vector.load %arg3[%c0_76, %c0_77] : memref<128x512xf32, #tpu.memory_space<vmem>>, vector<128x512xf32>
      %cst_78 = arith.constant dense<0.000000e+00> : vector<2x512xf32>
      %138 = tpu.matmul %136, %137, %cst_78 {dimension_numbers = #tpu.dot_dimension_numbers<[1], [0], [0], [1], [0, 0, 1, 1], [], []>} : vector<2x128xf32>, vector<128x512xf32>, vector<2x512xf32> -> vector<2x512xf32>
      %139 = arith.addf %82, %138 : vector<2x512xf32>
      %140 = vector.extract_strided_slice %139 {offsets = [0, 0], sizes = [2, 128], strides = [1, 1]} : vector<2x512xf32> to vector<2x128xf32>
      %141 = arith.negf %140 : vector<2x128xf32>
      %142 = math.exp %141 : vector<2x128xf32>
      %cst_79 = arith.constant 1.000000e+00 : f32
      %143 = vector.broadcast %cst_79 : f32 to vector<2x128xf32>
      %144 = arith.addf %143, %142 : vector<2x128xf32>
      %145 = arith.divf %143, %144 : vector<2x128xf32>
      %146 = vector.extract_strided_slice %139 {offsets = [0, 128], sizes = [2, 128], strides = [1, 1]} : vector<2x512xf32> to vector<2x128xf32>
      %147 = arith.negf %146 : vector<2x128xf32>
      %148 = math.exp %147 : vector<2x128xf32>
      %cst_80 = arith.constant 1.000000e+00 : f32
      %149 = vector.broadcast %cst_80 : f32 to vector<2x128xf32>
      %150 = arith.addf %149, %148 : vector<2x128xf32>
      %151 = arith.divf %149, %150 : vector<2x128xf32>
      %152 = vector.extract_strided_slice %139 {offsets = [0, 256], sizes = [2, 128], strides = [1, 1]} : vector<2x512xf32> to vector<2x128xf32>
      %153 = math.tanh %152 : vector<2x128xf32>
      %154 = vector.extract_strided_slice %139 {offsets = [0, 384], sizes = [2, 128], strides = [1, 1]} : vector<2x512xf32> to vector<2x128xf32>
      %155 = arith.negf %154 : vector<2x128xf32>
      %156 = math.exp %155 : vector<2x128xf32>
      %cst_81 = arith.constant 1.000000e+00 : f32
      %157 = vector.broadcast %cst_81 : f32 to vector<2x128xf32>
      %158 = arith.addf %157, %156 : vector<2x128xf32>
      %159 = arith.divf %157, %158 : vector<2x128xf32>
      %160 = arith.mulf %151, %134 : vector<2x128xf32>
      %161 = arith.mulf %145, %153 : vector<2x128xf32>
      %162 = arith.addf %160, %161 : vector<2x128xf32>
      %163 = math.tanh %162 : vector<2x128xf32>
      %164 = arith.mulf %159, %163 : vector<2x128xf32>
      %c0_82 = arith.constant 0 : index
      %c0_83 = arith.constant 0 : index
      %165 = vector.load %arg3[%c0_82, %c0_83] : memref<128x512xf32, #tpu.memory_space<vmem>>, vector<128x512xf32>
      %cst_84 = arith.constant dense<0.000000e+00> : vector<2x512xf32>
      %166 = tpu.matmul %164, %165, %cst_84 {dimension_numbers = #tpu.dot_dimension_numbers<[1], [0], [0], [1], [0, 0, 1, 1], [], []>} : vector<2x128xf32>, vector<128x512xf32>, vector<2x512xf32> -> vector<2x512xf32>
      %167 = arith.addf %82, %166 : vector<2x512xf32>
      %168 = vector.extract_strided_slice %167 {offsets = [0, 0], sizes = [2, 128], strides = [1, 1]} : vector<2x512xf32> to vector<2x128xf32>
      %169 = arith.negf %168 : vector<2x128xf32>
      %170 = math.exp %169 : vector<2x128xf32>
      %cst_85 = arith.constant 1.000000e+00 : f32
      %171 = vector.broadcast %cst_85 : f32 to vector<2x128xf32>
      %172 = arith.addf %171, %170 : vector<2x128xf32>
      %173 = arith.divf %171, %172 : vector<2x128xf32>
      %174 = vector.extract_strided_slice %167 {offsets = [0, 128], sizes = [2, 128], strides = [1, 1]} : vector<2x512xf32> to vector<2x128xf32>
      %175 = arith.negf %174 : vector<2x128xf32>
      %176 = math.exp %175 : vector<2x128xf32>
      %cst_86 = arith.constant 1.000000e+00 : f32
      %177 = vector.broadcast %cst_86 : f32 to vector<2x128xf32>
      %178 = arith.addf %177, %176 : vector<2x128xf32>
      %179 = arith.divf %177, %178 : vector<2x128xf32>
      %180 = vector.extract_strided_slice %167 {offsets = [0, 256], sizes = [2, 128], strides = [1, 1]} : vector<2x512xf32> to vector<2x128xf32>
      %181 = math.tanh %180 : vector<2x128xf32>
      %182 = vector.extract_strided_slice %167 {offsets = [0, 384], sizes = [2, 128], strides = [1, 1]} : vector<2x512xf32> to vector<2x128xf32>
      %183 = arith.negf %182 : vector<2x128xf32>
      %184 = math.exp %183 : vector<2x128xf32>
      %cst_87 = arith.constant 1.000000e+00 : f32
      %185 = vector.broadcast %cst_87 : f32 to vector<2x128xf32>
      %186 = arith.addf %185, %184 : vector<2x128xf32>
      %187 = arith.divf %185, %186 : vector<2x128xf32>
      %188 = arith.mulf %179, %162 : vector<2x128xf32>
      %189 = arith.mulf %173, %181 : vector<2x128xf32>
      %190 = arith.addf %188, %189 : vector<2x128xf32>
      %191 = math.tanh %190 : vector<2x128xf32>
      %192 = arith.mulf %187, %191 : vector<2x128xf32>
      %193 = tpu.concatenate %108, %136, %164, %192 in 0 : vector<2x128xf32>, vector<2x128xf32>, vector<2x128xf32>, vector<2x128xf32> -> vector<8x128xf32>
      %194 = tpu.transpose %193, [1, 0] : vector<8x128xf32> -> vector<128x8xf32>
      %195 = vector.extract_strided_slice %194 {offsets = [0, 0], sizes = [32, 8], strides = [1, 1]} : vector<128x8xf32> to vector<32x8xf32>
      %196 = vector.shape_cast %195 : vector<32x8xf32> to vector<4x8x8xf32>
      %c1_88 = arith.constant 1 : index
      %c1_89 = arith.constant 1 : index
      %c0_90 = arith.constant 0 : index
      %197 = vector.load %arg10[%c1_88, %c1_89, %c0_90] : memref<6x10x64xf32, #tpu.memory_space<vmem>>, vector<4x8x8xf32>
      tpu.vector_store %arg10[%c1_88, %c1_89, %c0_90], %196 {strides = array<i32>} : memref<6x10x64xf32, #tpu.memory_space<vmem>>, vector<4x8x8xf32>,
      %198 = vector.extract_strided_slice %194 {offsets = [32, 0], sizes = [32, 8], strides = [1, 1]} : vector<128x8xf32> to vector<32x8xf32>
      %199 = vector.shape_cast %198 : vector<32x8xf32> to vector<4x8x8xf32>
      %c1_91 = arith.constant 1 : index
      %c1_92 = arith.constant 1 : index
      %c8_93 = arith.constant 8 : index
      %200 = vector.load %arg10[%c1_91, %c1_92, %c8_93] : memref<6x10x64xf32, #tpu.memory_space<vmem>>, vector<4x8x8xf32>
      tpu.vector_store %arg10[%c1_91, %c1_92, %c8_93], %199 {strides = array<i32>} : memref<6x10x64xf32, #tpu.memory_space<vmem>>, vector<4x8x8xf32>,
      %201 = vector.extract_strided_slice %194 {offsets = [64, 0], sizes = [32, 8], strides = [1, 1]} : vector<128x8xf32> to vector<32x8xf32>
      %202 = vector.shape_cast %201 : vector<32x8xf32> to vector<4x8x8xf32>
      %c1_94 = arith.constant 1 : index
      %c1_95 = arith.constant 1 : index
      %c16 = arith.constant 16 : index
      %203 = vector.load %arg10[%c1_94, %c1_95, %c16] : memref<6x10x64xf32, #tpu.memory_space<vmem>>, vector<4x8x8xf32>
      tpu.vector_store %arg10[%c1_94, %c1_95, %c16], %202 {strides = array<i32>} : memref<6x10x64xf32, #tpu.memory_space<vmem>>, vector<4x8x8xf32>,
      %204 = vector.extract_strided_slice %194 {offsets = [96, 0], sizes = [32, 8], strides = [1, 1]} : vector<128x8xf32> to vector<32x8xf32>
      %205 = vector.shape_cast %204 : vector<32x8xf32> to vector<4x8x8xf32>
      %c1_96 = arith.constant 1 : index
      %c1_97 = arith.constant 1 : index
      %c24 = arith.constant 24 : index
      %206 = vector.load %arg10[%c1_96, %c1_97, %c24] : memref<6x10x64xf32, #tpu.memory_space<vmem>>, vector<4x8x8xf32>
      tpu.vector_store %arg10[%c1_96, %c1_97, %c24], %205 {strides = array<i32>} : memref<6x10x64xf32, #tpu.memory_space<vmem>>, vector<4x8x8xf32>,
    } else {
    }
    %cst = arith.constant 0.000000e+00 : f32
    %3 = vector.broadcast %cst : f32 to vector<32x64xf32>
    %c0 = arith.constant 0 : index
    %c0_1 = arith.constant 0 : index
    %c0_2 = arith.constant 0 : index
    %4 = vector.load %arg10[%c0, %c0_1, %c0_2] : memref<6x10x64xf32, #tpu.memory_space<vmem>>, vector<6x8x64xf32>
    %5 = vector.extract_strided_slice %4 {offsets = [0, 0, 0], sizes = [4, 8, 64], strides = [1, 1, 1]} : vector<6x8x64xf32> to vector<4x8x64xf32>
    %6 = vector.shape_cast %5 : vector<4x8x64xf32> to vector<32x64xf32>
    %c0_3 = arith.constant 0 : index
    %c0_4 = arith.constant 0 : index
    %c0_5 = arith.constant 0 : index
    %c0_6 = arith.constant 0 : index
    %7 = vector.load %arg5[%c0_3, %c0_4, %c0_5, %c0_6] : memref<1x9x64x64xf32, #tpu.memory_space<vmem>>, vector<1x1x64x64xf32>
    %8 = vector.shape_cast %7 : vector<1x1x64x64xf32> to vector<64x64xf32>
    %cst_7 = arith.constant dense<0.000000e+00> : vector<32x64xf32>
    %9 = tpu.matmul %6, %8, %cst_7 {dimension_numbers = #tpu.dot_dimension_numbers<[1], [0], [0], [1], [0, 0, 1, 1], [], []>} : vector<32x64xf32>, vector<64x64xf32>, vector<32x64xf32> -> vector<32x64xf32>
    %10 = arith.addf %3, %9 : vector<32x64xf32>
    %11 = vector.extract_strided_slice %4 {offsets = [1, 0, 0], sizes = [4, 8, 64], strides = [1, 1, 1]} : vector<6x8x64xf32> to vector<4x8x64xf32>
    %12 = vector.shape_cast %11 : vector<4x8x64xf32> to vector<32x64xf32>
    %c0_8 = arith.constant 0 : index
    %c3 = arith.constant 3 : index
    %c0_9 = arith.constant 0 : index
    %c0_10 = arith.constant 0 : index
    %13 = vector.load %arg5[%c0_8, %c3, %c0_9, %c0_10] : memref<1x9x64x64xf32, #tpu.memory_space<vmem>>, vector<1x1x64x64xf32>
    %14 = vector.shape_cast %13 : vector<1x1x64x64xf32> to vector<64x64xf32>
    %cst_11 = arith.constant dense<0.000000e+00> : vector<32x64xf32>
    %15 = tpu.matmul %12, %14, %cst_11 {dimension_numbers = #tpu.dot_dimension_numbers<[1], [0], [0], [1], [0, 0, 1, 1], [], []>} : vector<32x64xf32>, vector<64x64xf32>, vector<32x64xf32> -> vector<32x64xf32>
    %16 = arith.addf %10, %15 : vector<32x64xf32>
    %17 = vector.extract_strided_slice %4 {offsets = [2, 0, 0], sizes = [4, 8, 64], strides = [1, 1, 1]} : vector<6x8x64xf32> to vector<4x8x64xf32>
    %18 = vector.shape_cast %17 : vector<4x8x64xf32> to vector<32x64xf32>
    %c0_12 = arith.constant 0 : index
    %c6 = arith.constant 6 : index
    %c0_13 = arith.constant 0 : index
    %c0_14 = arith.constant 0 : index
    %19 = vector.load %arg5[%c0_12, %c6, %c0_13, %c0_14] : memref<1x9x64x64xf32, #tpu.memory_space<vmem>>, vector<1x1x64x64xf32>
    %20 = vector.shape_cast %19 : vector<1x1x64x64xf32> to vector<64x64xf32>
    %cst_15 = arith.constant dense<0.000000e+00> : vector<32x64xf32>
    %21 = tpu.matmul %18, %20, %cst_15 {dimension_numbers = #tpu.dot_dimension_numbers<[1], [0], [0], [1], [0, 0, 1, 1], [], []>} : vector<32x64xf32>, vector<64x64xf32>, vector<32x64xf32> -> vector<32x64xf32>
    %22 = arith.addf %16, %21 : vector<32x64xf32>
    %c0_16 = arith.constant 0 : index
    %c1 = arith.constant 1 : index
    %c0_17 = arith.constant 0 : index
    %23 = vector.load %arg10[%c0_16, %c1, %c0_17] : memref<6x10x64xf32, #tpu.memory_space<vmem>>, vector<6x8x64xf32>
    %24 = vector.extract_strided_slice %23 {offsets = [0, 0, 0], sizes = [4, 8, 64], strides = [1, 1, 1]} : vector<6x8x64xf32> to vector<4x8x64xf32>
    %25 = vector.shape_cast %24 : vector<4x8x64xf32> to vector<32x64xf32>
    %c0_18 = arith.constant 0 : index
    %c1_19 = arith.constant 1 : index
    %c0_20 = arith.constant 0 : index
    %c0_21 = arith.constant 0 : index
    %26 = vector.load %arg5[%c0_18, %c1_19, %c0_20, %c0_21] : memref<1x9x64x64xf32, #tpu.memory_space<vmem>>, vector<1x1x64x64xf32>
    %27 = vector.shape_cast %26 : vector<1x1x64x64xf32> to vector<64x64xf32>
    %cst_22 = arith.constant dense<0.000000e+00> : vector<32x64xf32>
    %28 = tpu.matmul %25, %27, %cst_22 {dimension_numbers = #tpu.dot_dimension_numbers<[1], [0], [0], [1], [0, 0, 1, 1], [], []>} : vector<32x64xf32>, vector<64x64xf32>, vector<32x64xf32> -> vector<32x64xf32>
    %29 = arith.addf %22, %28 : vector<32x64xf32>
    %30 = vector.extract_strided_slice %23 {offsets = [1, 0, 0], sizes = [4, 8, 64], strides = [1, 1, 1]} : vector<6x8x64xf32> to vector<4x8x64xf32>
    %31 = vector.shape_cast %30 : vector<4x8x64xf32> to vector<32x64xf32>
    %c0_23 = arith.constant 0 : index
    %c4 = arith.constant 4 : index
    %c0_24 = arith.constant 0 : index
    %c0_25 = arith.constant 0 : index
    %32 = vector.load %arg5[%c0_23, %c4, %c0_24, %c0_25] : memref<1x9x64x64xf32, #tpu.memory_space<vmem>>, vector<1x1x64x64xf32>
    %33 = vector.shape_cast %32 : vector<1x1x64x64xf32> to vector<64x64xf32>
    %cst_26 = arith.constant dense<0.000000e+00> : vector<32x64xf32>
    %34 = tpu.matmul %31, %33, %cst_26 {dimension_numbers = #tpu.dot_dimension_numbers<[1], [0], [0], [1], [0, 0, 1, 1], [], []>} : vector<32x64xf32>, vector<64x64xf32>, vector<32x64xf32> -> vector<32x64xf32>
    %35 = arith.addf %29, %34 : vector<32x64xf32>
    %36 = vector.extract_strided_slice %23 {offsets = [2, 0, 0], sizes = [4, 8, 64], strides = [1, 1, 1]} : vector<6x8x64xf32> to vector<4x8x64xf32>
    %37 = vector.shape_cast %36 : vector<4x8x64xf32> to vector<32x64xf32>
    %c0_27 = arith.constant 0 : index
    %c7 = arith.constant 7 : index
    %c0_28 = arith.constant 0 : index
    %c0_29 = arith.constant 0 : index
    %38 = vector.load %arg5[%c0_27, %c7, %c0_28, %c0_29] : memref<1x9x64x64xf32, #tpu.memory_space<vmem>>, vector<1x1x64x64xf32>
    %39 = vector.shape_cast %38 : vector<1x1x64x64xf32> to vector<64x64xf32>
    %cst_30 = arith.constant dense<0.000000e+00> : vector<32x64xf32>
    %40 = tpu.matmul %37, %39, %cst_30 {dimension_numbers = #tpu.dot_dimension_numbers<[1], [0], [0], [1], [0, 0, 1, 1], [], []>} : vector<32x64xf32>, vector<64x64xf32>, vector<32x64xf32> -> vector<32x64xf32>
    %41 = arith.addf %35, %40 : vector<32x64xf32>
    %c0_31 = arith.constant 0 : index
    %c2 = arith.constant 2 : index
    %c0_32 = arith.constant 0 : index
    %42 = vector.load %arg10[%c0_31, %c2, %c0_32] : memref<6x10x64xf32, #tpu.memory_space<vmem>>, vector<6x8x64xf32>
    %43 = vector.extract_strided_slice %42 {offsets = [0, 0, 0], sizes = [4, 8, 64], strides = [1, 1, 1]} : vector<6x8x64xf32> to vector<4x8x64xf32>
    %44 = vector.shape_cast %43 : vector<4x8x64xf32> to vector<32x64xf32>
    %c0_33 = arith.constant 0 : index
    %c2_34 = arith.constant 2 : index
    %c0_35 = arith.constant 0 : index
    %c0_36 = arith.constant 0 : index
    %45 = vector.load %arg5[%c0_33, %c2_34, %c0_35, %c0_36] : memref<1x9x64x64xf32, #tpu.memory_space<vmem>>, vector<1x1x64x64xf32>
    %46 = vector.shape_cast %45 : vector<1x1x64x64xf32> to vector<64x64xf32>
    %cst_37 = arith.constant dense<0.000000e+00> : vector<32x64xf32>
    %47 = tpu.matmul %44, %46, %cst_37 {dimension_numbers = #tpu.dot_dimension_numbers<[1], [0], [0], [1], [0, 0, 1, 1], [], []>} : vector<32x64xf32>, vector<64x64xf32>, vector<32x64xf32> -> vector<32x64xf32>
    %48 = arith.addf %41, %47 : vector<32x64xf32>
    %49 = vector.extract_strided_slice %42 {offsets = [1, 0, 0], sizes = [4, 8, 64], strides = [1, 1, 1]} : vector<6x8x64xf32> to vector<4x8x64xf32>
    %50 = vector.shape_cast %49 : vector<4x8x64xf32> to vector<32x64xf32>
    %c0_38 = arith.constant 0 : index
    %c5 = arith.constant 5 : index
    %c0_39 = arith.constant 0 : index
    %c0_40 = arith.constant 0 : index
    %51 = vector.load %arg5[%c0_38, %c5, %c0_39, %c0_40] : memref<1x9x64x64xf32, #tpu.memory_space<vmem>>, vector<1x1x64x64xf32>
    %52 = vector.shape_cast %51 : vector<1x1x64x64xf32> to vector<64x64xf32>
    %cst_41 = arith.constant dense<0.000000e+00> : vector<32x64xf32>
    %53 = tpu.matmul %50, %52, %cst_41 {dimension_numbers = #tpu.dot_dimension_numbers<[1], [0], [0], [1], [0, 0, 1, 1], [], []>} : vector<32x64xf32>, vector<64x64xf32>, vector<32x64xf32> -> vector<32x64xf32>
    %54 = arith.addf %48, %53 : vector<32x64xf32>
    %55 = vector.extract_strided_slice %42 {offsets = [2, 0, 0], sizes = [4, 8, 64], strides = [1, 1, 1]} : vector<6x8x64xf32> to vector<4x8x64xf32>
    %56 = vector.shape_cast %55 : vector<4x8x64xf32> to vector<32x64xf32>
    %c0_42 = arith.constant 0 : index
    %c8 = arith.constant 8 : index
    %c0_43 = arith.constant 0 : index
    %c0_44 = arith.constant 0 : index
    %57 = vector.load %arg5[%c0_42, %c8, %c0_43, %c0_44] : memref<1x9x64x64xf32, #tpu.memory_space<vmem>>, vector<1x1x64x64xf32>
    %58 = vector.shape_cast %57 : vector<1x1x64x64xf32> to vector<64x64xf32>
    %cst_45 = arith.constant dense<0.000000e+00> : vector<32x64xf32>
    %59 = tpu.matmul %56, %58, %cst_45 {dimension_numbers = #tpu.dot_dimension_numbers<[1], [0], [0], [1], [0, 0, 1, 1], [], []>} : vector<32x64xf32>, vector<64x64xf32>, vector<32x64xf32> -> vector<32x64xf32>
    %60 = arith.addf %54, %59 : vector<32x64xf32>
    %c0_46 = arith.constant 0 : index
    %c0_47 = arith.constant 0 : index
    %c0_48 = arith.constant 0 : index
    %61 = vector.load %arg6[%c0_46, %c0_47, %c0_48] : memref<1x1x64xf32, #tpu.memory_space<vmem>>, vector<1x1x64xf32>
    %62 = vector.shape_cast %61 : vector<1x1x64xf32> to vector<1x64xf32>
    %63 = vector.broadcast %62 : vector<1x64xf32> to vector<32x64xf32>
    %64 = arith.addf %60, %63 : vector<32x64xf32>
    %cst_49 = arith.constant 0.000000e+00 : f32
    %65 = vector.broadcast %cst_49 : f32 to vector<32x64xf32>
    %66 = arith.cmpf ogt, %64, %65 : vector<32x64xf32>
    %cst_50 = arith.constant 1.000000e-01 : f32
    %67 = vector.broadcast %cst_50 : f32 to vector<32x64xf32>
    %68 = arith.mulf %67, %64 : vector<32x64xf32>
    %69 = arith.select %66, %64, %68 : vector<32x64xi1>, vector<32x64xf32>
    %70 = vector.shape_cast %69 : vector<32x64xf32> to vector<4x8x64xf32>
    %c1_51 = arith.constant 1 : index
    %c1_52 = arith.constant 1 : index
    %c0_53 = arith.constant 0 : index
    %71 = vector.load %arg10[%c1_51, %c1_52, %c0_53] : memref<6x10x64xf32, #tpu.memory_space<vmem>>, vector<4x8x64xf32>
    tpu.vector_store %arg10[%c1_51, %c1_52, %c0_53], %70 {strides = array<i32>} : memref<6x10x64xf32, #tpu.memory_space<vmem>>, vector<4x8x64xf32>,
    %c3_i32 = arith.constant 3 : i32
    %72 = arith.cmpi eq, %arg0, %c3_i32 : i32
    %73 = arith.extui %72 : i1 to i32
    %c0_i32_54 = arith.constant 0 : i32
    %74 = arith.cmpi ne, %73, %c0_i32_54 : i32
    scf.if %74 {
      %c0_55 = arith.constant 0 : index
      %c0_56 = arith.constant 0 : index
      %75 = vector.load %arg7[%c0_55, %c0_56] : memref<64x8xf32, #tpu.memory_space<vmem>>, vector<64x8xf32>
      %cst_57 = arith.constant dense<0.000000e+00> : vector<32x8xf32>
      %76 = tpu.matmul %69, %75, %cst_57 {dimension_numbers = #tpu.dot_dimension_numbers<[1], [0], [0], [1], [0, 0, 1, 1], [], []>} : vector<32x64xf32>, vector<64x8xf32>, vector<32x8xf32> -> vector<32x8xf32>
      %c0_58 = arith.constant 0 : index
      %c0_59 = arith.constant 0 : index
      %77 = memref.load %arg8[%c0_58, %c0_59] : memref<1x1xf32, #tpu.memory_space<smem>>
      %78 = vector.broadcast %77 : f32 to vector<32x8xf32>
      %79 = arith.addf %76, %78 : vector<32x8xf32>
      %c0_60 = arith.constant 0 : index
      %c0_61 = arith.constant 0 : index
      %80 = vector.load %arg9[%c0_60, %c0_61] : memref<32x8xf32, #tpu.memory_space<vmem>>, vector<32x8xf32>
      tpu.vector_store %arg9[%c0_60, %c0_61], %79 {strides = array<i32>} : memref<32x8xf32, #tpu.memory_space<vmem>>, vector<32x8xf32>,
    } else {
    }
    return
  }
  func.func @transform_0(%arg0: i32) -> (i32, i32) {
    %c0_i32 = arith.constant 0 : i32
    %c0_i32_0 = arith.constant 0 : i32
    %c0_i32_1 = arith.constant 0 : i32
    return %c0_i32, %c0_i32_0 : i32, i32
  }
  func.func @transform_1(%arg0: i32) -> (i32, i32) {
    %c0_i32 = arith.constant 0 : i32
    %c0_i32_0 = arith.constant 0 : i32
    %c0_i32_1 = arith.constant 0 : i32
    return %c0_i32, %c0_i32_0 : i32, i32
  }
  func.func @transform_2(%arg0: i32) -> (i32, i32) {
    %c0_i32 = arith.constant 0 : i32
    %c0_i32_0 = arith.constant 0 : i32
    %c0_i32_1 = arith.constant 0 : i32
    return %c0_i32, %c0_i32_0 : i32, i32
  }
  func.func @transform_3(%arg0: i32) -> (i32, i32) {
    %c0_i32 = arith.constant 0 : i32
    %c0_i32_0 = arith.constant 0 : i32
    %c0_i32_1 = arith.constant 0 : i32
    return %c0_i32, %c0_i32_0 : i32, i32
  }
  func.func @transform_4(%arg0: i32) -> (i32, i32, i32, i32) {
    %c0_i32 = arith.constant 0 : i32
    %c0_i32_0 = arith.constant 0 : i32
    %c0_i32_1 = arith.constant 0 : i32
    %c0_i32_2 = arith.constant 0 : i32
    return %arg0, %c0_i32, %c0_i32_0, %c0_i32_1 : i32, i32, i32, i32
  }
  func.func @transform_5(%arg0: i32) -> (i32, i32, i32) {
    %c0_i32 = arith.constant 0 : i32
    %c0_i32_0 = arith.constant 0 : i32
    %c0_i32_1 = arith.constant 0 : i32
    return %arg0, %c0_i32, %c0_i32_0 : i32, i32, i32
  }
  func.func @transform_6(%arg0: i32) -> (i32, i32) {
    %c0_i32 = arith.constant 0 : i32
    %c0_i32_0 = arith.constant 0 : i32
    %c0_i32_1 = arith.constant 0 : i32
    return %c0_i32, %c0_i32_0 : i32, i32
  }
  func.func @transform_7(%arg0: i32) -> (i32, i32) {
    %c0_i32 = arith.constant 0 : i32
    %c0_i32_0 = arith.constant 0 : i32
    %c0_i32_1 = arith.constant 0 : i32
    return %c0_i32, %c0_i32_0 : i32, i32
  }
  func.func @transform_8(%arg0: i32) -> (i32, i32) {
    %c0_i32 = arith.constant 0 : i32
    %c0_i32_0 = arith.constant 0 : i32
    %c0_i32_1 = arith.constant 0 : i32
    return %c0_i32, %c0_i32_0 : i32, i32
  }
}

</mosaic_0001>

<bundles_post_ra>
// kernel: erp_decoder_forward.1
= control target key start
LH: loop header
LB: loop body
LE: loop exit
PB: predicated region body
PF: predicated region fallthrough
CT: control target
= control target key end

     0   :  { %s4480_s0 = inlined_call_operand.hbm [shape: f32[2,16], index: 0, kind: input, shape index: {}]   ;;  %s4481_s1 = inlined_call_operand.hbm [shape: f32[16,512], index: 1, kind: input, shape index: {}]   ;;  %s4482_s2 = inlined_call_operand.hbm [shape: f32[128,512], index: 2, kind: input, shape index: {}]   ;;  %s4483_s3 = inlined_call_operand.hbm [shape: f32[1,512], index: 3, kind: input, shape index: {}]   ;;  %s4484_s4 = inlined_call_operand.hbm [shape: f32[4,9,64,64], index: 4, kind: input, shape index: {}]   ;;  %s4485_s5 = inlined_call_operand.hbm [shape: f32[4,1,64], index: 5, kind: input, shape index: {}]   ;;  %s4486_s6 = inlined_call_operand.vmem [shape: f32[64,8], index: 6, kind: input, shape index: {}]   ;;  %s4487_s7 = inlined_call_operand.<no memory space> [shape: f32[1,1], index: 7, kind: input, shape index: {}]   ;;  %s4488_s8 = inlined_call_operand.vmem [shape: f32[32,8], index: 8, kind: output, shape index: {}]  }
   0x1   :  { %4500 = sst [smem:[#allocation18_spill]] %s4480_s0 }
   0x2   :  { %4501 = sst [smem:[#allocation19_spill]] %s4481_s1 }
   0x3   :  { %4502 = sst [smem:[#allocation20_spill]] %s4484_s4 }
   0x4   :  { %13 = sst [smem:[#allocation3]] %s4487_s7 }
   0x5   :  { %14 = vsyncpa [#allocation5], 0 }
   0x6   :  { %15 = vsyncpa [#allocation7], 0 }
   0x7   :  { %16 = vsyncpa [#allocation10], 0  ;;  %s3815_s29 = smov 0   ;;  %s3817_s30 = smov 0  }
   0x8   :  { %s3819_s9 = smov 0   ;;  %s3821_s10 = smov 0  }
   0x9 LB: > { %s3834_s7 = sadd.s32 4294967295, %s3751_s10   ;;  %p126_p0 = scmp.ne.s32.totalorder %s3743_s30, %s3739_s29  ;;  %s3751_s10 = sphi %s3821_s10, %s4532_s10   ;;  %s3747_s9 = sphi %s3819_s9, %s4531_s9   ;;  %s3743_s30 = sphi %s3817_s30, %s4530_s30   ;;  %s3739_s29 = sphi %s3815_s29, %s4529_s29  }
   0xa   : > { %p4489_p1 = scmp.eq.s32.totalorder %s3834_s7, 0  ;;  %p2489_p2 = scmp.ge.s32.totalorder %s3751_s10, 1 }
   0xb   : > { %p226_p3 = scmp.lt.s32.totalorder %s3751_s10, 5  ;;  %s3753_s13 = smov [#allocation4]  }
   0xc   : > { %p3843_p5 = por %p4489_p1, %p126_p0  ;;  %s239_s14 = sshll.u32 %s3753_s13, 4  ;;  %s240_s14 = int_to_ptr.vmem [resolvable:$true] %s239_s14 }
   0xd   : > { %p3847_p6 = pnand %p2489_p2, %p226_p3  ;;  %s3754_s15 = smov [#allocation6]  }
   0xe   : > { %s4503_s11 = scalar_select %p3843_p5, 1, 0 }
   0xf   : > { %s4504_s12 = scalar_select %p3847_p6, 1, 0 }
  0x10   : > { %p3396_p7 = pneg %p3847_p6  ;;  %s249_s16 = sshll.u32 %s3754_s15, 4  ;;  %s3859_s16 = int_to_ptr.vmem [resolvable:$true] %s249_s16 }
  0x11   : > { %s4506_s0 = sld [smem:[#allocation18_spill]] }
  0x12   : > { %p3855_p8 = pnand %p3396_p7, %p4489_p1 }
  0x14   : > { %s4505_s17 = scalar_select %p3855_p8, 1, 0 }
  0x15   : > { %p3869_p10 = pneg %p3855_p8 }
  0x17   : > { %s3533_s20 = scalar_lea.hbm %s4506_s0, 32 }
  0x18   : > { %p3534_p9 = scmp.ne.s32.totalorder %s4506_s0, %s3533_s20  ;;  %p3540_p13 = scmp.lt.u32.totalorder %s3533_s20, %s4506_s0 }
  0x1a   : > { %p3536_p11 = pnand %p3869_p10, %p3534_p9 }
  0x1c   : > { %p3537_p12 = pneg %p3536_p11 }
  0x1e   : > { %p3542_p0 = pnand %p3540_p13, %p3537_p12 }
  0x20   : > { %3545 = shalt.err (!%p3542_p0)
}
  0x21   : > { %s3546_s26 = scalar_lea.vmem %s240_s14, 32  ;;  %p3554_p4 = scmp.lt.s32.totalorder %s240_s14, %s240_s14 }
  0x22   : > { %p3547_p2 = scmp.ne.s32.totalorder %s240_s14, %s3546_s26  ;;  %p3555_p1 = scmp.lt.s32.totalorder %s3546_s26, %s3546_s26 }
  0x24   : > { %p3549_p3 = pnand %p3547_p2, %p3869_p10  ;;  %p3556_p5 = por %p3555_p1, %p3554_p4 }
  0x26   : > { %p3550_p7 = pneg %p3549_p3 }
  0x28   : > { %p3557_p6 = pnand %p3556_p5, %p3550_p7 }
  0x2a   : > { %3560 = shalt.err (!%p3557_p6)
}
  0x2b   : > { %3399 = dma.hbm_to_vmem [thread:$0]  (!%p3855_p8), %s4506_s0, 32, %s240_s14, [#allocation5]  }
  0x2c   : > { %s4508_s1 = sld [smem:[#allocation19_spill]] }
  0x32   : > { %s3561_s15 = scalar_lea.hbm %s4508_s1, 1024 }
  0x33   : > { %p3562_p9 = scmp.ne.s32.totalorder %s4508_s1, %s3561_s15  ;;  %p3568_p4 = scmp.lt.u32.totalorder %s3561_s15, %s4508_s1 }
  0x35   : > { %p3564_p11 = pnand %p3562_p9, %p3869_p10 }
  0x37   : > { %p3565_p1 = pneg %p3564_p11 }
  0x39   : > { %p3570_p5 = pnand %p3568_p4, %p3565_p1 }
  0x3b   : > { %3573 = shalt.err (!%p3570_p5)
}
  0x3c   : > { %s3574_s14 = scalar_lea.vmem %s3859_s16, 1024  ;;  %p3582_p0 = scmp.lt.s32.totalorder %s3859_s16, %s3859_s16 }
  0x3d   : > { %p3575_p6 = scmp.ne.s32.totalorder %s3859_s16, %s3574_s14  ;;  %p3583_p2 = scmp.lt.s32.totalorder %s3574_s14, %s3574_s14 }
  0x3f   : > { %p3577_p12 = pnand %p3575_p6, %p3869_p10  ;;  %p3584_p3 = por %p3583_p2, %p3582_p0 }
  0x41   : > { %p3578_p13 = pneg %p3577_p12 }
  0x43   : > { %p3585_p7 = pnand %p3584_p3, %p3578_p13 }
  0x45   : > { %3588 = shalt.err (!%p3585_p7)
}
  0x46   : > { %s4493_s22 = smov 512   ;;  %s4494_s24 = smov 32  }
  0x47   : > { %3402 = dma.hbm_to_vmem [thread:$0]  (!%p3855_p8), %s4508_s1, 1024, %s3859_s16, [#allocation7], %s4493_s22, %s4493_s22, %s4494_s24  }
  0x48   : > { %s3912_s27 = sadd.s32 1, %s3751_s10   ;;  %s113_s28 = sadd.s32 1, %s3747_s9 }
  0x49   : > { %s110_s29 = ssub.s32 %s3751_s10, %s3912_s27  ;;  %p120_p9 = scmp.ne.s32.totalorder %s3747_s9, %s3743_s30 }
  0x4a   : > { %p111_p11 = scmp.eq.s32.totalorder %s110_s29, 0  ;;  %p121_p1 = scmp.eq.s32.totalorder %s3751_s10, 0 }
  0x4b   : > { %p3420_p4 = scmp.lt.s32.totalorder %s3751_s10, 4  ;;  %s293_s13 = sand.u32 1, %s3751_s10  }
  0x4c   : > { %s3923_s15 = scalar_select %p111_p11, %s3747_s9, %s113_s28  }
  0x4d   : > { %p122_p5 = por %p121_p1, %p120_p9  ;;  %s4492_s18 = sand.u32 1, %s3747_s9  }
  0x4e   : > { %4509 = sst [smem:[#allocation17_spill]] %s3923_s15  ;;  %s3374_s19 = smul.u32 9216, %s3751_s10 }
  0x4f   : > { %s3373_s20 = smul.u32 576, %s4492_s18  ;;  %p3929_p6 = pnand %p3420_p4, %p122_p5 }
  0x50   : > { %s4511_s4 = sld [smem:[#allocation20_spill]]  ;;  %s3940_s29 = scalar_lea.sflag [#allocation5], %s293_s13 }
  0x51   : > { %s4510_s21 = scalar_select %p3929_p6, 1, 0 }
  0x52   : > { %s297_s26 = scalar_lea.vmem [#allocation11], %s3373_s20  ;;  %p4497_p13 = pneg %p3929_p6 }
  0x53   : > { %s304_s28 = sshll.u32 %s297_s26, 4  ;;  %s3938_s28 = int_to_ptr.vmem [resolvable:$true] %s304_s28 }
  0x56   : > { %s3936_s25 = scalar_lea.hbm %s4511_s4, %s3374_s19  ;;  %s3594_s14 = scalar_lea.hbm %s4511_s4, 36864 }
  0x57   : > { %s3589_s18 = scalar_lea.hbm %s3936_s25, 9216  ;;  %p3595_p3 = scmp.lt.u32.totalorder %s3936_s25, %s4511_s4 }
  0x58   : > { %p3590_p12 = scmp.ne.s32.totalorder %s3936_s25, %s3589_s18  ;;  %p3596_p7 = scmp.lt.u32.totalorder %s3594_s14, %s3589_s18 }
  0x59   : > { %p3598_p11 = scmp.lt.u32.totalorder %s3589_s18, %s3936_s25 }
  0x5a   : > { %p3592_p0 = pnand %p4497_p13, %p3590_p12  ;;  %p3597_p9 = por %p3596_p7, %p3595_p3 }
  0x5c   : > { %p3593_p2 = pneg %p3592_p0  ;;  %p3599_p1 = por %p3598_p11, %p3597_p9 }
  0x5e   : > { %p3600_p4 = pnand %p3599_p1, %p3593_p2 }
  0x60   : > { %3603 = shalt.err (!%p3600_p4)
}
  0x61   : > { %s3604_s13 = scalar_lea.vmem %s3938_s28, 9216  ;;  %s3757_s20 = smov [#allocation11]  }
  0x62   : > { %p3605_p5 = scmp.ne.s32.totalorder %s3938_s28, %s3604_s13  ;;  %s3609_s26 = sshll.u32 %s3757_s20, 4  ;;  %s3610_s26 = int_to_ptr.vmem [resolvable:$false] %s3609_s26 }
  0x63   : > { %s3611_s22 = scalar_lea.vmem %s3610_s26, 18432  ;;  %p3612_p8 = scmp.lt.s32.totalorder %s3938_s28, %s3610_s26 }
  0x64   : > { %p3607_p12 = pnand %p3605_p5, %p4497_p13  ;;  %p3613_p3 = scmp.lt.s32.totalorder %s3611_s22, %s3604_s13 }
  0x66   : > { %p3608_p0 = pneg %p3607_p12  ;;  %p3614_p7 = por %p3613_p3, %p3612_p8 }
  0x68   : > { %p3615_p9 = pnand %p3614_p7, %p3608_p0 }
  0x6a   : > { %3618 = shalt.err (!%p3615_p9)
}
  0x6b   : > { %s3758_s24 = smov 128   ;;  %s3759_s18 = smov 8  }
  0x6c   : > { %3412 = dma.hbm_to_vmem [thread:$0]  (!%p3929_p6), %s3936_s25, 9216, %s3938_s28, %s3940_s29, %s3758_s24, %s3758_s24, %s3759_s18  }
  0x6d   : > { %s3760_s19 = smov [#allocation8]   ;;  %s3761_s14 = smov [#allocation9]  }
  0x6e   : > { %s262_s16 = sshll.u32 %s3760_s19, 4  ;;  %s276_s20 = sshll.u32 %s3761_s14, 4  ;;  %s263_s16 = int_to_ptr.vmem [resolvable:$true] %s262_s16  ;;  %s277_s20 = int_to_ptr.vmem [resolvable:$true] %s276_s20 }
  0x6f   : > { %s3619_s13 = scalar_lea.hbm %s4482_s2, 8192 }
  0x70   : > { %p3620_p8 = scmp.ne.s32.totalorder %s4482_s2, %s3619_s13  ;;  %p3626_p1 = scmp.lt.u32.totalorder %s3619_s13, %s4482_s2 }
  0x72   : > { %p3622_p2 = pnand %p3620_p8, %p3869_p10 }
  0x74   : > { %p3623_p11 = pneg %p3622_p2 }
  0x76   : > { %p3628_p4 = pnand %p3626_p1, %p3623_p11 }
  0x78   : > { %3631 = shalt.err (!%p3628_p4)
}
  0x79   : > { %s3632_s25 = scalar_lea.vmem %s263_s16, 8192  ;;  %p3640_p3 = scmp.lt.s32.totalorder %s263_s16, %s263_s16 }
  0x7a   : > { %p3633_p5 = scmp.ne.s32.totalorder %s263_s16, %s3632_s25  ;;  %p3641_p7 = scmp.lt.s32.totalorder %s3632_s25, %s3632_s25 }
  0x7c   : > { %p3635_p12 = pnand %p3633_p5, %p3869_p10  ;;  %p3642_p9 = por %p3641_p7, %p3640_p3 }
  0x7e   : > { %p3636_p0 = pneg %p3635_p12 }
  0x80   : > { %p3643_p13 = pnand %p3642_p9, %p3636_p0 }
  0x82   : > { %3646 = shalt.err (!%p3643_p13)
}
  0x83   : > { %p4512_p8 = scmp.ne.s32.totalorder %s4505_s17, 0  ;;  %s4513_s0 = smov 32  }
  0x84   : > { %s4514_s1 = smov 512   ;;  %s3647_s18 = scalar_lea.hbm %s4483_s3, 64 }
  0x85   : > { %3405 = dma.hbm_to_vmem [thread:$0]  (!%p4512_p8), %s4482_s2, 8192, %s263_s16, [#allocation7], %s4514_s1, %s4514_s1, %s4513_s0  }
  0x86   : > { %p3648_p2 = scmp.ne.s32.totalorder %s4483_s3, %s3647_s18  ;;  %p3654_p1 = scmp.lt.u32.totalorder %s3647_s18, %s4483_s3 }
  0x88   : > { %p3650_p13 = pnand %p3648_p2, %p3869_p10 }
  0x8a   : > { %p3651_p11 = pneg %p3650_p13 }
  0x8c   : > { %p3656_p4 = pnand %p3654_p1, %p3651_p11 }
  0x8e   : > { %3659 = shalt.err (!%p3656_p4)
}
  0x8f   : > { %s3660_s22 = scalar_lea.vmem %s277_s20, 64  ;;  %p3668_p3 = scmp.lt.s32.totalorder %s277_s20, %s277_s20 }
  0x90   : > { %p3661_p5 = scmp.ne.s32.totalorder %s277_s20, %s3660_s22  ;;  %p3669_p7 = scmp.lt.s32.totalorder %s3660_s22, %s3660_s22 }
  0x92   : > { %p3663_p12 = pnand %p3661_p5, %p3869_p10  ;;  %p3670_p9 = por %p3669_p7, %p3668_p3 }
  0x94   : > { %p3664_p0 = pneg %p3663_p12 }
  0x96   : > { %p3671_p6 = pnand %p3670_p9, %p3664_p0 }
  0x98   : > { %3674 = shalt.err (!%p3671_p6)
}
  0x99   : > { %3408 = dma.hbm_to_vmem [thread:$0]  (!%p4512_p8), %s4483_s3, 64, %s277_s20, [#allocation10]  }
  0x9a   : > { %s2496_s0 = sshll.u32 %s3751_s10, 4  ;;  %s4515_s1 = sand.u32 1, %s3747_s9  }
  0x9b   : > { %s317_s4 = scalar_lea.vmem [#allocation12], %s4515_s1  ;;  %s322_s24 = scalar_lea.hbm %s4485_s5, %s2496_s0 }
  0x9c   : > { %s324_s23 = sshll.u32 %s317_s4, 4  ;;  %s3675_s18 = scalar_lea.hbm %s322_s24, 16  ;;  %s325_s23 = int_to_ptr.vmem [resolvable:$true] %s324_s23 }
  0x9d   : > { %p3676_p10 = scmp.ne.s32.totalorder %s322_s24, %s3675_s18  ;;  %p4516_p6 = scmp.ne.s32.totalorder %s4510_s21, 0 }
  0x9e   : > { %s3680_s14 = scalar_lea.hbm %s4485_s5, 64  ;;  %p3681_p8 = scmp.lt.u32.totalorder %s322_s24, %s4485_s5 }
  0x9f   : > { %p4517_p2 = pneg %p4516_p6  ;;  %p3682_p1 = scmp.lt.u32.totalorder %s3680_s14, %s3675_s18 }
  0xa0   : > { %p3684_p5 = scmp.lt.u32.totalorder %s3675_s18, %s322_s24 }
  0xa1   : > { %p3678_p13 = pnand %p3676_p10, %p4517_p2  ;;  %p3683_p4 = por %p3682_p1, %p3681_p8 }
  0xa3   : > { %p3679_p11 = pneg %p3678_p13  ;;  %p3685_p12 = por %p3684_p5, %p3683_p4 }
  0xa5   : > { %p3686_p0 = pnand %p3685_p12, %p3679_p11 }
  0xa7   : > { %3689 = shalt.err (!%p3686_p0)
}
  0xa8   : > { %s3690_s26 = scalar_lea.vmem %s325_s23, 16  ;;  %p4518_p7 = pmov %p4517_p2 }
  0xa9   : > { %p3691_p3 = scmp.ne.s32.totalorder %s325_s23, %s3690_s26  ;;  %s3762_s13 = smov [#allocation12]  }
  0xaa   : > { %s3695_s22 = sshll.u32 %s3762_s13, 4  ;;  %s3696_s22 = int_to_ptr.vmem [resolvable:$false] %s3695_s22 }
  0xab   : > { %p3693_p9 = pnand %p3691_p3, %p4518_p7  ;;  %s3697_s16 = scalar_lea.vmem %s3696_s22, 32 }
  0xac   : > { %p3698_p2 = scmp.lt.s32.totalorder %s325_s23, %s3696_s22  ;;  %p3699_p13 = scmp.lt.s32.totalorder %s3697_s16, %s3690_s26 }
  0xad   : > { %p3694_p10 = pneg %p3693_p9 }
  0xae   : > { %p3700_p1 = por %p3699_p13, %p3698_p2 }
  0xb0   : > { %p3701_p8 = pnand %p3700_p1, %p3694_p10 }
  0xb2   : > { %3704 = shalt.err (!%p3701_p8)
}
  0xb3   : > { %3415 = dma.hbm_to_vmem [thread:$0]  (!%p4516_p6), %s322_s24, 16, %s325_s23, %s3940_s29  }
  0xb4   : > { %p4519_p11 = scmp.ne.s32.totalorder %s4504_s12, 0 }
  0xb5   : > { %p4520_p4 = scmp.eq.s32.totalorder (!%p4519_p11), %s3834_s7, 0 }
  0xb6   : > { %333 = sbr.rel (%p4519_p11) target bundleno = 2072 (0x818), region = 52 }
  0xbd   : > { %3722 = dma.done.wait (%p4520_p4), [#allocation5], 32   ;;  %p4521_p5 = pmov %p4520_p4 }
  0xbe   : > { %p4522_p12 = pmov %p4520_p4 }
  0xbf   : > { %3724 = vsyncadd (%p4521_p5), [#allocation5], 4294967264 }
  0xc0   : > { %3726 = dma.done.wait (%p4522_p12), [#allocation7], 9216   ;;  %p4523_p0 = pmov %p4520_p4 }
  0xc2   : > { %3728 = vsyncadd (%p4523_p0), [#allocation7], 4294958080  ;;  %p4524_p3 = pmov %p4523_p0 }
  0xc3   : > { %p4525_p6 = pmov %p4523_p0 }
  0xc4   : > { %3730 = dma.done.wait (%p4524_p3), [#allocation10], 64  }
  0xc5   : > { %3732 = vsyncadd (%p4525_p6), [#allocation10], 4294967232  ;;  %s351_s12 = sand.u32 1, %s3834_s7   ;;  %s353_s21 = sand.u32 1, %s3743_s30  }
  0xc6   : > { %s3375_s29 = smul.u32 576, %s353_s21  ;;  %s352_s25 = scalar_lea.sflag [#allocation5], %s351_s12 }
  0xc7   : > { %p4526_p7 = scmp.ne.s32.totalorder %s4503_s11, 0 }
  0xc8   : > { %s4044_s0 = scalar_lea.vmem [#allocation11], %s3375_s29 }
  0xc9   : > { %3734 = dma.done.wait (%p4526_p7), %s352_s25, 9232  }
  0xca   : > { %3736 = vsyncadd (%p4526_p7), %s352_s25, 4294958064  ;;  %s4050_s1 = scalar_lea.vmem [#allocation12], %s353_s21  ;;  %p4527_p9 = scmp.ne.s32.totalorder %s3834_s7, 0 }
  0xcb   : > { %v415_v0 = vld [vmem:[#allocation6 + $0x8] sm:$0xff] (!%p4527_p9)  ;;  %v414_v2 = vld [vmem:[#allocation6] sm:$0xff] (!%p4527_p9)  ;;  %v3763_v5 = vmov (!%p4527_p9), 0.0   ;;  %v417_v6 = vld [vmem:[#allocation6 + $0x18] sm:$0xff] (!%p4527_p9)  ;;  %vm444_vm0 = vcmask (!%p4527_p9), 130048   ;;  %vm1197_vm1 = vcmask (!%p4527_p9), 1041408  }
  0xcc   : > { %398 = sbr.rel (%p4527_p9) target bundleno = 1551 (0x60f), region = 80  ;;  %v419_v1 = vld [vmem:[#allocation6 + $0x28] sm:$0xff] (!%p4527_p9)  ;;  %v418_v4 = vld [vmem:[#allocation6 + $0x20] sm:$0xff] (!%p4527_p9)  ;;  %512 = vmatprep.mubr.f32.mxu0 (!%p4527_p9), %v3763_v5  ;;  %583 = vmatprep.mubr.f32.mxu1 (!%p4527_p9), %v3763_v5  ;;  %v421_v8 = vld [vmem:[#allocation6 + $0x38] sm:$0xff] (!%p4527_p9)  ;;  %vm1199_vm2 = vcmask (!%p4527_p9), 1043456   ;;  %vm401_vm3 = vcmask (!%p4527_p9), 517120  }
  0xcd   : > { %v2965_v3 = vpack.c.bf16 (!%p4527_p9), %v419_v1, %v415_v0  ;;  %v2967_v7 = vpack.c.bf16 (!%p4527_p9), %v418_v4, %v414_v2  ;;  %v416_v9 = vld [vmem:[#allocation6 + $0x10] sm:$0xff] (!%p4527_p9)  ;;  %v2969_v11 = vpack.c.bf16 (!%p4527_p9), %v421_v8, %v417_v6  ;;  %v413_v13 = vld [vmem:[#allocation4] sm:$0x3] (!%p4527_p9)  ;;  %v615_v14 = vld [vmem:[#allocation8 + $0x8] sm:$0xff] (!%p4527_p9)  ;;  %402 = vst.msk [vmem:[#allocation2 + $0x8] sm:$0x3] (!%p4527_p9), %vm401_vm3, %v3763_v5 }
  0xce   : > { %v420_v10 = vld [vmem:[#allocation6 + $0x30] sm:$0xff] (!%p4527_p9)  ;;  %v619_v15 = vld [vmem:[#allocation8 + $0x28] sm:$0xff] (!%p4527_p9)  ;;  %v617_v16 = vld [vmem:[#allocation8 + $0x18] sm:$0xff] (!%p4527_p9)  ;;  %404 = vst.msk [vmem:[#allocation2 + $0x18] sm:$0x3] (!%p4527_p9), %vm401_vm3, %v3763_v5  ;;  %vm1201_vm4 = vcmask (!%p4527_p9), 1045504  }
  0xcf   : > { %2966 = vmatprep.subr.bf16.mxu0 (!%p4527_p9), %v2965_v3  ;;  %v2971_v12 = vpack.c.bf16 (!%p4527_p9), %v420_v10, %v416_v9  ;;  %2970 = vmatprep.subr.bf16.mxu1 (!%p4527_p9), %v2969_v11  ;;  %v4058_v17 = vpack.c.bf16 (!%p4527_p9), %v619_v15, %v615_v14  ;;  %v621_v18 = vld [vmem:[#allocation8 + $0x38] sm:$0xff] (!%p4527_p9)  ;;  %v614_v19 = vld [vmem:[#allocation8] sm:$0xff] (!%p4527_p9)  ;;  %v616_v23 = vld [vmem:[#allocation8 + $0x10] sm:$0xff] (!%p4527_p9)  ;;  %412 = vst.msk [vmem:[#allocation2 + $0x58] sm:$0x3] (!%p4527_p9), %vm401_vm3, %v3763_v5  ;;  %vm399_vm5 = vcmask (!%p4527_p9), 523264  }
  0xd0   : > { %2968 = vmatpush1.bf16.msra.mxu0 (!%p4527_p9), %v2967_v7  ;;  %v618_v20 = vld [vmem:[#allocation8 + $0x20] sm:$0xff] (!%p4527_p9)  ;;  %v4060_v21 = vpack.c.bf16 (!%p4527_p9), %v621_v18, %v617_v16  ;;  %v620_v24 = vld [vmem:[#allocation8 + $0x30] sm:$0xff] (!%p4527_p9)  ;;  %v623_v26 = vld [vmem:[#allocation8 + $0x48] sm:$0xff] (!%p4527_p9)  ;;  %406 = vst.msk [vmem:[#allocation2 + $0x28] sm:$0x3] (!%p4527_p9), %vm401_vm3, %v3763_v5  ;;  %vm1236_vm6 = vcmask (!%p4527_p9), 64512  }
  0xd1   : > { %2972 = vmatpush1.bf16.msra.mxu1 (!%p4527_p9), %v2971_v12  ;;  %v4062_v22 = vpack.c.bf16 (!%p4527_p9), %v618_v20, %v614_v19  ;;  %2974 = vmatprep.subr.bf16.mxu0 (!%p4527_p9), %v4058_v17  ;;  %v4065_v25 = vpack.c.bf16 (!%p4527_p9), %v620_v24, %v616_v23  ;;  %v627_v27 = vld [vmem:[#allocation8 + $0x68] sm:$0xff] (!%p4527_p9)  ;;  %v625_v28 = vld [vmem:[#allocation8 + $0x58] sm:$0xff] (!%p4527_p9)  ;;  %v622_v31 = vld [vmem:[#allocation8 + $0x40] sm:$0xff] (!%p4527_p9)  ;;  %408 = vst.msk [vmem:[#allocation2 + $0x38] sm:$0x3] (!%p4527_p9), %vm401_vm3, %v3763_v5  ;;  %s3764_s11 = smov (!%p4527_p9), 8  }
  0xd2   : > { %3006 = vmatprep.subr.bf16.mxu1 (!%p4527_p9), %v4060_v21  ;;  %v4070_v29 = vpack.c.bf16 (!%p4527_p9), %v627_v27, %v623_v26  ;;  %v629_v30 = vld [vmem:[#allocation8 + $0x78] sm:$0xff] (!%p4527_p9)  ;;  %v626_v32 = vld [vmem:[#allocation8 + $0x60] sm:$0xff] (!%p4527_p9)  ;;  %v624_v35 = vld [vmem:[#allocation8 + $0x50] sm:$0xff] (!%p4527_p9)  ;;  %410 = vst.msk [vmem:[#allocation2 + $0x48] sm:$0x3] (!%p4527_p9), %vm401_vm3, %v3763_v5  ;;  %s3765_s4 = smov (!%p4527_p9), 16  }
  0xd3   : > { %2503 = vmatmul.mubr.msk.f32.vlgmr.msra.gmra.mrb[0].mxu0 %vm444_vm0, %v413_v13  ;;  %v4072_v33 = vpack.c.bf16 %v629_v30, %v625_v28  ;;  %v4074_v34 = vpack.c.bf16 %v626_v32, %v622_v31  ;;  %v628_v36 = vld [vmem:[#allocation8 + $0x70] sm:$0xff]  ;;  %v631_v38 = vld [vmem:[#allocation8 + $0x88] sm:$0xff]  ;;  %v633_v40 = vld [vmem:[#allocation8 + $0x98] sm:$0xff]  ;;  %400 = vst.msk [vmem:[#allocation2] sm:$0xff] %vm399_vm5, %v3763_v5  ;;  %s3766_s23 = smov 24   ;;  %vm1257_vm7 = vcmask 130112  }
  0xd4   : > { %742 = vmatprep.mubr.f32.mxu0 %v3763_v5  ;;  %2504 = vmatmul.mubr.msk.f32.vlgmr.msra.gmra.mrb[0].mxu1 %vm444_vm0, %v413_v13  ;;  %v4077_v37 = vpack.c.bf16 %v628_v36, %v624_v35  ;;  %v635_v39 = vld [vmem:[#allocation8 + $0xa8] sm:$0xff]  ;;  %v637_v42 = vld [vmem:[#allocation8 + $0xb8] sm:$0xff]  ;;  %v630_v43 = vld [vmem:[#allocation8 + $0x80] sm:$0xff]  ;;  %403 = vst.msk [vmem:[#allocation2 + $0x10] sm:$0xff] %vm399_vm5, %v3763_v5  ;;  %vm1278_vm8 = vcmask 195712   ;;  %vm1299_vm9 = vcmask 261312  }
  0xd5   : > { %813 = vmatprep.mubr.f32.mxu1 %v3763_v5  ;;  %2976 = vmatpush1.bf16.msra.mxu0 %v4062_v22  ;;  %v4082_v41 = vpack.c.bf16 %v635_v39, %v631_v38  ;;  %v634_v44 = vld [vmem:[#allocation8 + $0xa0] sm:$0xff]  ;;  %v4084_v45 = vpack.c.bf16 %v637_v42, %v633_v40  ;;  %v632_v47 = vld [vmem:[#allocation8 + $0x90] sm:$0xff]  ;;  %v639_v50 = vld [vmem:[#allocation8 + $0xc8] sm:$0xff]  ;;  %411 = vst.msk [vmem:[#allocation2 + $0x50] sm:$0xff] %vm399_vm5, %v3763_v5 }
  0xd6   : > { %3008 = vmatpush1.bf16.msra.mxu1 %v4065_v25  ;;  %2978 = vmatprep.subr.bf16.mxu0 %v4070_v29  ;;  %v4086_v46 = vpack.c.bf16 %v634_v44, %v630_v43  ;;  %v636_v48 = vld [vmem:[#allocation8 + $0xb0] sm:$0xff]  ;;  %v643_v51 = vld [vmem:[#allocation8 + $0xe8] sm:$0xff]  ;;  %v641_v52 = vld [vmem:[#allocation8 + $0xd8] sm:$0xff]  ;;  %405 = vst.msk [vmem:[#allocation2 + $0x20] sm:$0xff] %vm399_vm5, %v3763_v5 }
  0xd7   : > { %3010 = vmatprep.subr.bf16.mxu1 %v4072_v33  ;;  %v4089_v49 = vpack.c.bf16 %v636_v48, %v632_v47  ;;  %v4094_v53 = vpack.c.bf16 %v643_v51, %v639_v50  ;;  %v645_v54 = vld [vmem:[#allocation8 + $0xf8] sm:$0xff]  ;;  %v638_v55 = vld [vmem:[#allocation8 + $0xc0] sm:$0xff]  ;;  %v640_v59 = vld [vmem:[#allocation8 + $0xd0] sm:$0xff]  ;;  %407 = vst.msk [vmem:[#allocation2 + $0x30] sm:$0xff] %vm399_vm5, %v3763_v5 }
  0xd8   : > { %v642_v56 = vld [vmem:[#allocation8 + $0xe0] sm:$0xff]  ;;  %v4096_v57 = vpack.c.bf16 %v645_v54, %v641_v52  ;;  %v644_v60 = vld [vmem:[#allocation8 + $0xf0] sm:$0xff]  ;;  %v647_v62 = vld [vmem:[#allocation8 + $0x108] sm:$0xff]  ;;  %409 = vst.msk [vmem:[#allocation2 + $0x40] sm:$0xff] %vm399_vm5, %v3763_v5 }
  0xd9   : > { %2980 = vmatpush1.bf16.msra.mxu0 %v4074_v34  ;;  %v4098_v58 = vpack.c.bf16 %v642_v56, %v638_v55  ;;  %v4101_v61 = vpack.c.bf16 %v644_v60, %v640_v59  ;;  %v651_v63 = vld [vmem:[#allocation8 + $0x128] sm:$0xff]  ;;  %v649_v0 = vld [vmem:[#allocation8 + $0x118] sm:$0xff]  ;;  %v646_v3 = vld [vmem:[#allocation8 + $0x100] sm:$0xff] }
  0xda   : > { %3012 = vmatpush1.bf16.msra.mxu1 %v4077_v37  ;;  %2982 = vmatprep.subr.bf16.mxu0 %v4082_v41  ;;  %v4106_v1 = vpack.c.bf16 %v651_v63, %v647_v62  ;;  %v653_v2 = vld [vmem:[#allocation8 + $0x138] sm:$0xff]  ;;  %v650_v4 = vld [vmem:[#allocation8 + $0x120] sm:$0xff]  ;;  %v648_v8 = vld [vmem:[#allocation8 + $0x110] sm:$0xff]  ;;  %v424_v63 = vlaneseq }
  0xdb   : > { %3014 = vmatprep.subr.bf16.mxu1 %v4084_v45  ;;  %v4108_v6 = vpack.c.bf16 %v653_v2, %v649_v0  ;;  %v4110_v7 = vpack.c.bf16 %v650_v4, %v646_v3  ;;  %v652_v9 = vld [vmem:[#allocation8 + $0x130] sm:$0xff]  ;;  %v655_v10 = vld [vmem:[#allocation8 + $0x148] sm:$0xff]  ;;  %v657_v13 = vld [vmem:[#allocation8 + $0x158] sm:$0xff] }
  0xdc   : > { %v4113_v11 = vpack.c.bf16 %v652_v9, %v648_v8  ;;  %v659_v12 = vld [vmem:[#allocation8 + $0x168] sm:$0xff]  ;;  %v661_v14 = vld [vmem:[#allocation8 + $0x178] sm:$0xff]  ;;  %v654_v18 = vld [vmem:[#allocation8 + $0x140] sm:$0xff]  ;;  %v425_v0 = vshrl.u32 %v424_v63, 7 }
  0xdd   : > { %2984 = vmatpush1.bf16.msra.mxu0 %v4086_v46  ;;  %v4117_v15 = vpack.c.bf16 %v659_v12, %v655_v10  ;;  %v4119_v16 = vpack.c.bf16 %v661_v14, %v657_v13  ;;  %v658_v19 = vld [vmem:[#allocation8 + $0x160] sm:$0xff]  ;;  %v656_v20 = vld [vmem:[#allocation8 + $0x150] sm:$0xff]  ;;  %v663_v26 = vld [vmem:[#allocation8 + $0x188] sm:$0xff] }
  0xde   : > { %3016 = vmatpush1.bf16.msra.mxu1 %v4089_v49  ;;  %2986 = vmatprep.subr.bf16.mxu0 %v4094_v53  ;;  %v4122_v23 = vpack.c.bf16 %v658_v19, %v654_v18  ;;  %v660_v24 = vld [vmem:[#allocation8 + $0x170] sm:$0xff]  ;;  %v667_v27 = vld [vmem:[#allocation8 + $0x1a8] sm:$0xff]  ;;  %v665_v31 = vld [vmem:[#allocation8 + $0x198] sm:$0xff]  ;;  %v426_v2 = vsub.s32 0, %v425_v0  ;;  %v430_v4 = vsub.s32 1, %v425_v0  ;;  %v438_v10 = vsub.s32 3, %v425_v0 }
  0xdf   : > { %3018 = vmatprep.subr.bf16.mxu1 %v4096_v57  ;;  %v4126_v28 = vpack.c.bf16 %v660_v24, %v656_v20  ;;  %v4128_v30 = vpack.c.bf16 %v667_v27, %v663_v26  ;;  %v669_v32 = vld [vmem:[#allocation8 + $0x1b8] sm:$0xff]  ;;  %v662_v35 = vld [vmem:[#allocation8 + $0x180] sm:$0xff]  ;;  %v664_v39 = vld [vmem:[#allocation8 + $0x190] sm:$0xff] }
  0xe0   : > { %v4130_v36 = vpack.c.bf16 %v669_v32, %v665_v31  ;;  %v666_v38 = vld [vmem:[#allocation8 + $0x1a0] sm:$0xff]  ;;  %v668_v40 = vld [vmem:[#allocation8 + $0x1b0] sm:$0xff]  ;;  %v671_v43 = vld [vmem:[#allocation8 + $0x1c8] sm:$0xff]  ;;  %v434_v31 = vsub.s32 2, %v425_v0 }
  0xe1   : > { %2988 = vmatpush1.bf16.msra.mxu0 %v4098_v58  ;;  %v4133_v42 = vpack.c.bf16 %v666_v38, %v662_v35  ;;  %v675_v44 = vld [vmem:[#allocation8 + $0x1e8] sm:$0xff]  ;;  %v673_v47 = vld [vmem:[#allocation8 + $0x1d8] sm:$0xff]  ;;  %v4137_v48 = vpack.c.bf16 %v668_v40, %v664_v39  ;;  %v670_v52 = vld [vmem:[#allocation8 + $0x1c0] sm:$0xff] }
  0xe2   : > { %3020 = vmatpush1.bf16.msra.mxu1 %v4101_v61  ;;  %2990 = vmatprep.subr.bf16.mxu0 %v4106_v1  ;;  %v4139_v50 = vpack.c.bf16 %v675_v44, %v671_v43  ;;  %v677_v51 = vld [vmem:[#allocation8 + $0x1f8] sm:$0xff]  ;;  %v674_v54 = vld [vmem:[#allocation8 + $0x1e0] sm:$0xff]  ;;  %v672_v56 = vld [vmem:[#allocation8 + $0x1d0] sm:$0xff] }
  0xe3   : > { %3022 = vmatprep.subr.bf16.mxu1 %v4108_v6  ;;  %v4142_v55 = vpack.c.bf16 %v677_v51, %v673_v47  ;;  %v676_v59 = vld [vmem:[#allocation8 + $0x1f0] sm:$0xff]  ;;  %v4145_v60 = vpack.c.bf16 %v674_v54, %v670_v52  ;;  %v422_v3 = vld [vmem:[#allocation9] sm:$0xf] }
  0xe4   : > { %v4149_v62 = vpack.c.bf16 %v676_v59, %v672_v56  ;;  %v427_v8 = vrot.slane %v422_v3, %v426_v2  ;;  %v431_v9 = vrot.slane %v422_v3, %v430_v4  ;;  %v439_v24 = vrot.slane %v422_v3, %v438_v10 }
  0xe5   : > { %2992 = vmatpush1.bf16.msra.mxu0 %v4110_v7  ;;  %v435_v35 = vrot.slane %v422_v3, %v434_v31 }
  0xe6   : > { %3024 = vmatpush1.bf16.msra.mxu1 %v4113_v11  ;;  %2994 = vmatprep.subr.bf16.mxu0 %v4117_v15 }
  0xe7   : > { %3026 = vmatprep.subr.bf16.mxu1 %v4119_v16 }
  0xe9   : > { %2996 = vmatpush1.bf16.msra.mxu0 %v4122_v23 }
  0xea   : > { %3028 = vmatpush1.bf16.msra.mxu1 %v4126_v28  ;;  %2998 = vmatprep.subr.bf16.mxu0 %v4128_v30 }
  0xeb   : > { %3030 = vmatprep.subr.bf16.mxu1 %v4130_v36 }
  0xed   : > { %3000 = vmatpush1.bf16.msra.mxu0 %v4133_v42 }
  0xee   : > { %3032 = vmatpush1.bf16.msra.mxu1 %v4137_v48  ;;  %3002 = vmatprep.subr.bf16.mxu0 %v4139_v50 }
  0xef   : > { %3034 = vmatprep.subr.bf16.mxu1 %v4142_v55 }
  0xf1   : > { %3004 = vmatpush1.bf16.msra.mxu0 %v4145_v60 }
  0xf2   : > { %3036 = vmatpush1.bf16.msra.mxu1 %v4149_v62  ;;  %3038 = vmatprep.subr.bf16.mxu0 %v4058_v17 }
  0xf3   : > { %3070 = vmatprep.subr.bf16.mxu1 %v4060_v21 }
 0x1a6   : > { %v514_v12 = vpop.f32.mrb[0].mxu0 }
 0x1a7   : > { %v4156_v13 = vadd.f32 %v514_v12, %v427_v8  ;;  %v516_v14 = vpop.f32.mrb[1].mxu0  ;;  %v585_v19 = vpop.f32.mrb[0].mxu1 }
 0x1a8   : > { %v4158_v18 = vadd.f32 %v516_v14, %v431_v9  ;;  %v587_v26 = vpop.f32.mrb[1].mxu1  ;;  %v4165_v39 = vadd.f32 %v585_v19, %v435_v35 }
 0x1a9   : > { %v2505_v20 = vmul.f32 -1.442695, %v4156_v13  ;;  %v4162_v32 = vadd.f32 %v587_v26, %v439_v24 }
 0x1aa   : > { %v2506_v27 = vmul.f32 -1.442695, %v4158_v18 }
 0x1ab   : > { %3469 = vpow2.f32 %v2505_v20  ;;  %v2507_v38 = vmul.f32 -1.442695, %v4162_v32 }
 0x1ac   : > { %3471 = vpow2.f32 %v2506_v27 }
 0x1ad   : > { %3473 = vpow2.f32 %v2507_v38 }
 0x1ae   : > { %3475 = vtanh.f32 %v4165_v39 }
 0x1b5   : > { %v3470_v40 = vpop.eup %3469 }
 0x1b6   : > { %v3472_v43 = vpop.eup %3471  ;;  %v593_v44 = vadd.f32 1.0, %v3470_v40 }
 0x1b7   : > { %v599_v47 = vadd.f32 1.0, %v3472_v43  ;;  %v3474_v51 = vpop.eup %3473 }
 0x1b8   : > { %3477 = vrcp.f32 %v593_v44  ;;  %v3476_v52 = vpop.eup %3475  ;;  %v606_v56 = vadd.f32 1.0, %v3474_v51 }
 0x1b9   : > { %3479 = vrcp.f32 %v599_v47 }
 0x1ba   : > { %3481 = vrcp.f32 %v606_v56 }
 0x1c2   : > { %v3478_v54 = vpop.eup %3477 }
 0x1c3   : > { %v3480_v59 = vpop.eup %3479  ;;  %v610_v63 = vmul.f32 %v3478_v54, %v3476_v52 }
 0x1c4   : > { %v609_v0 = vmul.f32 0.0, %v3480_v59  ;;  %v3482_v3 = vpop.eup %3481 }
 0x1c6   : > { %v4168_v2 = vadd.f32 %v610_v63, %v609_v0 }
 0x1c8   : > { %3483 = vtanh.f32 %v4168_v2 }
 0x1d2   : > { %v3484_v4 = vpop.eup %3483 }
 0x1d3   : > { %v4171_v8 = vmul.f32 %v3484_v4, %v3482_v3 }
 0x1d5   : > { %743 = vmatmul.mubr.f32.vlgmr.msra.gmra.mrb[2].mxu0 %v4171_v8  ;;  %814 = vmatmul.mubr.f32.vlgmr.msra.gmra.mrb[2].mxu1 %v4171_v8 }
 0x1d6   : > { %3040 = vmatpush1.bf16.msra.mxu0 %v4062_v22  ;;  %3072 = vmatpush1.bf16.msra.mxu1 %v4065_v25 }
 0x1d7   : > { %3042 = vmatprep.subr.bf16.mxu0 %v4070_v29  ;;  %3074 = vmatprep.subr.bf16.mxu1 %v4072_v33 }
 0x1d8   : > { %912 = vmatprep.mubr.f32.mxu0 %v3763_v5  ;;  %983 = vmatprep.mubr.f32.mxu1 %v3763_v5 }
 0x1da   : > { %3044 = vmatpush1.bf16.msra.mxu0 %v4074_v34  ;;  %3076 = vmatpush1.bf16.msra.mxu1 %v4077_v37 }
 0x1db   : > { %3046 = vmatprep.subr.bf16.mxu0 %v4082_v41  ;;  %3078 = vmatprep.subr.bf16.mxu1 %v4084_v45 }
 0x1de   : > { %3048 = vmatpush1.bf16.msra.mxu0 %v4086_v46  ;;  %3080 = vmatpush1.bf16.msra.mxu1 %v4089_v49 }
 0x1df   : > { %3050 = vmatprep.subr.bf16.mxu0 %v4094_v53  ;;  %3082 = vmatprep.subr.bf16.mxu1 %v4096_v57 }
 0x1e2   : > { %3052 = vmatpush1.bf16.msra.mxu0 %v4098_v58  ;;  %3084 = vmatpush1.bf16.msra.mxu1 %v4101_v61 }
 0x1e3   : > { %3054 = vmatprep.subr.bf16.mxu0 %v4106_v1  ;;  %3086 = vmatprep.subr.bf16.mxu1 %v4108_v6 }
 0x1e6   : > { %3056 = vmatpush1.bf16.msra.mxu0 %v4110_v7  ;;  %3088 = vmatpush1.bf16.msra.mxu1 %v4113_v11 }
 0x1e7   : > { %3058 = vmatprep.subr.bf16.mxu0 %v4117_v15  ;;  %3090 = vmatprep.subr.bf16.mxu1 %v4119_v16 }
 0x1ea   : > { %3060 = vmatpush1.bf16.msra.mxu0 %v4122_v23  ;;  %3092 = vmatpush1.bf16.msra.mxu1 %v4126_v28 }
 0x1eb   : > { %3062 = vmatprep.subr.bf16.mxu0 %v4128_v30  ;;  %3094 = vmatprep.subr.bf16.mxu1 %v4130_v36 }
 0x1ee   : > { %3064 = vmatpush1.bf16.msra.mxu0 %v4133_v42  ;;  %3096 = vmatpush1.bf16.msra.mxu1 %v4137_v48 }
 0x1ef   : > { %3066 = vmatprep.subr.bf16.mxu0 %v4139_v50  ;;  %3098 = vmatprep.subr.bf16.mxu1 %v4142_v55 }
 0x1f2   : > { %3068 = vmatpush1.bf16.msra.mxu0 %v4145_v60  ;;  %3100 = vmatpush1.bf16.msra.mxu1 %v4149_v62 }
 0x1f3   : > { %3102 = vmatprep.subr.bf16.mxu0 %v4058_v17  ;;  %3134 = vmatprep.subr.bf16.mxu1 %v4060_v21 }
 0x2a8   : > { %v744_v9 = vpop.f32.mrb[2].mxu0  ;;  %v815_v10 = vpop.f32.mrb[2].mxu1 }
 0x2a9   : > { %v820_v12 = vadd.f32 %v744_v9, %v4156_v13  ;;  %v746_v14 = vpop.f32.mrb[3].mxu0  ;;  %v817_v19 = vpop.f32.mrb[3].mxu1  ;;  %v822_v35 = vadd.f32 %v815_v10, %v4165_v39 }
 0x2aa   : > { %v821_v20 = vadd.f32 %v746_v14, %v4158_v18  ;;  %v823_v27 = vadd.f32 %v817_v19, %v4162_v32 }
 0x2ab   : > { %v2508_v24 = vmul.f32 -1.442695, %v820_v12 }
 0x2ac   : > { %v2509_v26 = vmul.f32 -1.442695, %v821_v20  ;;  %v2510_v31 = vmul.f32 -1.442695, %v823_v27 }
 0x2ad   : > { %3485 = vpow2.f32 %v2508_v24 }
 0x2ae   : > { %3487 = vpow2.f32 %v2509_v26 }
 0x2af   : > { %3489 = vpow2.f32 %v2510_v31 }
 0x2b0   : > { %3491 = vtanh.f32 %v822_v35 }
 0x2b7   : > { %v3486_v17 = vpop.eup %3485 }
 0x2b8   : > { %v3488_v38 = vpop.eup %3487  ;;  %v827_v21 = vadd.f32 1.0, %v3486_v17 }
 0x2b9   : > { %v833_v40 = vadd.f32 1.0, %v3488_v38  ;;  %v3490_v43 = vpop.eup %3489 }
 0x2ba   : > { %3493 = vrcp.f32 %v827_v21  ;;  %v3492_v44 = vpop.eup %3491  ;;  %v840_v54 = vadd.f32 1.0, %v3490_v43 }
 0x2bb   : > { %3495 = vrcp.f32 %v833_v40 }
 0x2bc   : > { %3497 = vrcp.f32 %v840_v54 }
 0x2c4   : > { %v3494_v47 = vpop.eup %3493 }
 0x2c5   : > { %v3496_v51 = vpop.eup %3495  ;;  %v844_v52 = vmul.f32 %v3494_v47, %v3492_v44 }
 0x2c6   : > { %v843_v56 = vmul.f32 %v3496_v51, %v4168_v2  ;;  %v3498_v63 = vpop.eup %3497 }
 0x2c8   : > { %v4214_v59 = vadd.f32 %v844_v52, %v843_v56 }
 0x2ca   : > { %3499 = vtanh.f32 %v4214_v59 }
 0x2d4   : > { %v3500_v0 = vpop.eup %3499 }
 0x2d5   : > { %v4217_v3 = vmul.f32 %v3500_v0, %v3498_v63 }
 0x2d7   : > { %913 = vmatmul.mubr.f32.vlgmr.msra.gmra.mrb[4].mxu0 %v4217_v3  ;;  %984 = vmatmul.mubr.f32.vlgmr.msra.gmra.mrb[4].mxu1 %v4217_v3 }
 0x2d8   : > { %3104 = vmatpush1.bf16.msra.mxu0 %v4062_v22  ;;  %3136 = vmatpush1.bf16.msra.mxu1 %v4065_v25 }
 0x2d9   : > { %3106 = vmatprep.subr.bf16.mxu0 %v4070_v29  ;;  %3138 = vmatprep.subr.bf16.mxu1 %v4072_v33 }
 0x2da   : > { %1082 = vmatprep.mubr.f32.mxu0 %v3763_v5  ;;  %1153 = vmatprep.mubr.f32.mxu1 %v3763_v5 }
 0x2dc   : > { %3108 = vmatpush1.bf16.msra.mxu0 %v4074_v34  ;;  %3140 = vmatpush1.bf16.msra.mxu1 %v4077_v37 }
 0x2dd   : > { %3110 = vmatprep.subr.bf16.mxu0 %v4082_v41  ;;  %3142 = vmatprep.subr.bf16.mxu1 %v4084_v45 }
 0x2e0   : > { %3112 = vmatpush1.bf16.msra.mxu0 %v4086_v46  ;;  %3144 = vmatpush1.bf16.msra.mxu1 %v4089_v49 }
 0x2e1   : > { %3114 = vmatprep.subr.bf16.mxu0 %v4094_v53  ;;  %3146 = vmatprep.subr.bf16.mxu1 %v4096_v57 }
 0x2e4   : > { %3116 = vmatpush1.bf16.msra.mxu0 %v4098_v58  ;;  %3148 = vmatpush1.bf16.msra.mxu1 %v4101_v61 }
 0x2e5   : > { %3118 = vmatprep.subr.bf16.mxu0 %v4106_v1  ;;  %3150 = vmatprep.subr.bf16.mxu1 %v4108_v6 }
 0x2e8   : > { %3120 = vmatpush1.bf16.msra.mxu0 %v4110_v7  ;;  %3152 = vmatpush1.bf16.msra.mxu1 %v4113_v11 }
 0x2e9   : > { %3122 = vmatprep.subr.bf16.mxu0 %v4117_v15  ;;  %3154 = vmatprep.subr.bf16.mxu1 %v4119_v16 }
 0x2ec   : > { %3124 = vmatpush1.bf16.msra.mxu0 %v4122_v23  ;;  %3156 = vmatpush1.bf16.msra.mxu1 %v4126_v28 }
 0x2ed   : > { %3126 = vmatprep.subr.bf16.mxu0 %v4128_v30  ;;  %3158 = vmatprep.subr.bf16.mxu1 %v4130_v36 }
 0x2f0   : > { %3128 = vmatpush1.bf16.msra.mxu0 %v4133_v42  ;;  %3160 = vmatpush1.bf16.msra.mxu1 %v4137_v48  ;;  %v1189_v48 = vrot.slane %v4217_v3, 6 }
 0x2f1   : > { %3130 = vmatprep.subr.bf16.mxu0 %v4139_v50  ;;  %3162 = vmatprep.subr.bf16.mxu1 %v4142_v55 }
 0x2f4   : > { %3132 = vmatpush1.bf16.msra.mxu0 %v4145_v60  ;;  %3164 = vmatpush1.bf16.msra.mxu1 %v4149_v62  ;;  %v1198_v60 = vsel %vm1197_vm1, %v4171_v8, %v1189_v48 }
 0x3aa   : > { %v914_v22 = vpop.f32.mrb[4].mxu0  ;;  %v985_v25 = vpop.f32.mrb[4].mxu1 }
 0x3ab   : > { %v990_v29 = vadd.f32 %v914_v22, %v4156_v13  ;;  %v916_v33 = vpop.f32.mrb[5].mxu0  ;;  %v987_v34 = vpop.f32.mrb[5].mxu1  ;;  %v992_v53 = vadd.f32 %v985_v25, %v4165_v39 }
 0x3ac   : > { %v991_v37 = vadd.f32 %v916_v33, %v4158_v18  ;;  %v993_v46 = vadd.f32 %v987_v34, %v4162_v32 }
 0x3ad   : > { %v2511_v41 = vmul.f32 -1.442695, %v990_v29 }
 0x3ae   : > { %v2512_v45 = vmul.f32 -1.442695, %v991_v37  ;;  %v2513_v49 = vmul.f32 -1.442695, %v993_v46 }
 0x3af   : > { %3501 = vpow2.f32 %v2511_v41 }
 0x3b0   : > { %3503 = vpow2.f32 %v2512_v45 }
 0x3b1   : > { %3505 = vpow2.f32 %v2513_v49 }
 0x3b2   : > { %3507 = vtanh.f32 %v992_v53 }
 0x3b9   : > { %v3502_v57 = vpop.eup %3501 }
 0x3ba   : > { %v3504_v58 = vpop.eup %3503  ;;  %v997_v61 = vadd.f32 1.0, %v3502_v57 }
 0x3bb   : > { %v1003_v1 = vadd.f32 1.0, %v3504_v58  ;;  %v3506_v6 = vpop.eup %3505 }
 0x3bc   : > { %3509 = vrcp.f32 %v997_v61  ;;  %v3508_v7 = vpop.eup %3507  ;;  %v1010_v23 = vadd.f32 1.0, %v3506_v6 }
 0x3bd   : > { %3511 = vrcp.f32 %v1003_v1 }
 0x3be   : > { %3513 = vrcp.f32 %v1010_v23 }
 0x3c6   : > { %v3510_v11 = vpop.eup %3509 }
 0x3c7   : > { %v3512_v15 = vpop.eup %3511  ;;  %v1014_v16 = vmul.f32 %v3510_v11, %v3508_v7 }
 0x3c8   : > { %v1013_v28 = vmul.f32 %v3512_v15, %v4214_v59  ;;  %v3514_v36 = vpop.eup %3513 }
 0x3ca   : > { %v1015_v30 = vadd.f32 %v1014_v16, %v1013_v28 }
 0x3cc   : > { %3515 = vtanh.f32 %v1015_v30 }
 0x3d6   : > { %v3516_v42 = vpop.eup %3515 }
 0x3d7   : > { %v1017_v50 = vmul.f32 %v3516_v42, %v3514_v36 }
 0x3d9   : > { %1083 = vmatmul.mubr.f32.vlgmr.msra.gmra.mrb[6].mxu0 %v1017_v50  ;;  %1154 = vmatmul.mubr.f32.vlgmr.msra.gmra.mrb[6].mxu1 %v1017_v50  ;;  %v1192_v55 = vrot.slane %v1017_v50, 4 }
 0x3db   : > { %v1200_v62 = vsel %vm1199_vm2, %v1198_v60, %v1192_v55 }
 0x4ac   : > { %v1084_v2 = vpop.f32.mrb[6].mxu0  ;;  %v1155_v4 = vpop.f32.mrb[6].mxu1 }
 0x4ad   : > { %v1160_v9 = vadd.f32 %v1084_v2, %v4156_v13  ;;  %v1086_v10 = vpop.f32.mrb[7].mxu0  ;;  %v1157_v8 = vpop.f32.mrb[7].mxu1  ;;  %v1162_v26 = vadd.f32 %v1155_v4, %v4165_v39 }
 0x4ae   : > { %v1161_v12 = vadd.f32 %v1086_v10, %v4158_v18  ;;  %v1163_v20 = vadd.f32 %v1157_v8, %v4162_v32 }
 0x4af   : > { %v2514_v14 = vmul.f32 -1.442695, %v1160_v9 }
 0x4b0   : > { %v2515_v19 = vmul.f32 -1.442695, %v1161_v12  ;;  %v2516_v24 = vmul.f32 -1.442695, %v1163_v20 }
 0x4b1   : > { %3517 = vpow2.f32 %v2514_v14 }
 0x4b2   : > { %3519 = vpow2.f32 %v2515_v19 }
 0x4b3   : > { %3521 = vpow2.f32 %v2516_v24 }
 0x4b4   : > { %3523 = vtanh.f32 %v1162_v26 }
 0x4bb   : > { %v3518_v27 = vpop.eup %3517 }
 0x4bc   : > { %v3520_v31 = vpop.eup %3519  ;;  %v1167_v35 = vadd.f32 1.0, %v3518_v27 }
 0x4bd   : > { %v1173_v17 = vadd.f32 1.0, %v3520_v31  ;;  %v3522_v13 = vpop.eup %3521 }
 0x4be   : > { %3525 = vrcp.f32 %v1167_v35  ;;  %v3524_v38 = vpop.eup %3523  ;;  %v1180_v43 = vadd.f32 1.0, %v3522_v13 }
 0x4bf   : > { %3527 = vrcp.f32 %v1173_v17 }
 0x4c0   : > { %3529 = vrcp.f32 %v1180_v43 }
 0x4c8   : > { %v3526_v18 = vpop.eup %3525 }
 0x4c9   : > { %v3528_v21 = vpop.eup %3527  ;;  %v1184_v40 = vmul.f32 %v3526_v18, %v3524_v38 }
 0x4ca   : > { %v1183_v44 = vmul.f32 %v3528_v21, %v1015_v30  ;;  %v3530_v32 = vpop.eup %3529 }
 0x4cc   : > { %v1185_v47 = vadd.f32 %v1184_v40, %v1183_v44 }
 0x4ce   : > { %3531 = vtanh.f32 %v1185_v47 }
 0x4d8   : > { %v3532_v39 = vpop.eup %3531 }
 0x4d9   : > { %v1187_v51 = vmul.f32 %v3532_v39, %v3530_v32 }
 0x4db   : > { %v1195_v52 = vrot.slane %v1187_v51, 2 }
 0x4dd   : > { %v1202_v54 = vsel %vm1201_vm4, %v1200_v62, %v1195_v52 }
 0x4de   : > { %1203 = vxpose.xlu0.b32.start.end [1/1] (short) %v1202_v54, 128 }
 0x55e   : > { %v1219_v56 = vpop.trf.xlu0 }
 0x55f   : > { %1237 = vst.msk [vmem:[#allocation2 + $0x11] sm:$0xff] %vm1236_vm6, %v1219_v56 }
 0x562   : > { %v1220_v59 = vpop.trf.xlu0 }
 0x563   : > { %1238 = vst.msk [vmem:[#allocation2 + $0x21] sm:$0xff] %vm1236_vm6, %v1220_v59 }
 0x566   : > { %v1221_v63 = vpop.trf.xlu0 }
 0x567   : > { %1239 = vst.msk [vmem:[#allocation2 + $0x31] sm:$0xff] %vm1236_vm6, %v1221_v63 }
 0x56a   : > { %v1222_v0 = vpop.trf.xlu0 }
 0x56b   : > { %1240 = vst.msk [vmem:[#allocation2 + $0x41] sm:$0xff] %vm1236_vm6, %v1222_v0 }
 0x56e   : > { %v1223_v3 = vpop.trf.xlu0 }
 0x56f   : > { %1245 = vrot.lane.b32.xlu0 %v1223_v3, %s3764_s11 }
 0x572   : > { %v1224_v22 = vpop.trf.xlu0 }
 0x573   : > { %1247 = vrot.lane.b32.xlu1 %v1224_v22, %s3764_s11 }
 0x576   : > { %v1225_v25 = vpop.trf.xlu0 }
 0x577   : > { %1249 = vrot.lane.b32.xlu1 %v1225_v25, %s3764_s11 }
 0x57a   : > { %v1226_v29 = vpop.trf.xlu0 }
 0x57b   : > { %1251 = vrot.lane.b32.xlu1 %v1226_v29, %s3764_s11 }
 0x57e   : > { %v1227_v33 = vpop.trf.xlu0 }
 0x57f   : > { %1266 = vrot.lane.b32.xlu1 %v1227_v33, %s3765_s4 }
 0x582   : > { %v1228_v5 = vpop.trf.xlu0 }
 0x583   : > { %1268 = vrot.lane.b32.xlu1 %v1228_v5, %s3765_s4 }
 0x586   : > { %v1229_v34 = vpop.trf.xlu0 }
 0x587   : > { %1270 = vrot.lane.b32.xlu1 %v1229_v34, %s3765_s4 }
 0x58a   : > { %v1230_v37 = vpop.trf.xlu0 }
 0x58b   : > { %1272 = vrot.lane.b32.xlu1 %v1230_v37, %s3765_s4 }
 0x58e   : > { %v1231_v41 = vpop.trf.xlu0 }
 0x58f   : > { %1287 = vrot.lane.b32.xlu1 %v1231_v41, %s3766_s23 }
 0x592   : > { %v1232_v45 = vpop.trf.xlu0 }
 0x593   : > { %1289 = vrot.lane.b32.xlu1 %v1232_v45, %s3766_s23 }
 0x596   : > { %v1233_v46 = vpop.trf.xlu0 }
 0x597   : > { %1291 = vrot.lane.b32.xlu1 %v1233_v46, %s3766_s23 }
 0x59a   : > { %v1234_v49 = vpop.trf.xlu0 }
 0x59b   : > { %1293 = vrot.lane.b32.xlu1 %v1234_v49, %s3766_s23 }
 0x5e1   : > { %v1246_v53 = vpop.permute.xlu0 %1245 }
 0x5e2   : > { %1258 = vst.msk [vmem:[#allocation2 + $0x11] sm:$0xff] %vm1257_vm7, %v1246_v53 }
 0x5e5   : > { %v1248_v57 = vpop.permute.xlu1 %1247 }
 0x5e6   : > { %1259 = vst.msk [vmem:[#allocation2 + $0x21] sm:$0xff] %vm1257_vm7, %v1248_v57 }
 0x5e9   : > { %v1250_v58 = vpop.permute.xlu1 %1249 }
 0x5ea   : > { %1260 = vst.msk [vmem:[#allocation2 + $0x31] sm:$0xff] %vm1257_vm7, %v1250_v58 }
 0x5ed   : > { %v1252_v61 = vpop.permute.xlu1 %1251 }
 0x5ee   : > { %1261 = vst.msk [vmem:[#allocation2 + $0x41] sm:$0xff] %vm1257_vm7, %v1252_v61 }
 0x5f1   : > { %v1267_v1 = vpop.permute.xlu1 %1266 }
 0x5f2   : > { %1279 = vst.msk [vmem:[#allocation2 + $0x11] sm:$0xff] %vm1278_vm8, %v1267_v1 }
 0x5f5   : > { %v1269_v6 = vpop.permute.xlu1 %1268 }
 0x5f6   : > { %1280 = vst.msk [vmem:[#allocation2 + $0x21] sm:$0xff] %vm1278_vm8, %v1269_v6 }
 0x5f9   : > { %v1271_v7 = vpop.permute.xlu1 %1270 }
 0x5fa   : > { %1281 = vst.msk [vmem:[#allocation2 + $0x31] sm:$0xff] %vm1278_vm8, %v1271_v7 }
 0x5fd   : > { %v1273_v11 = vpop.permute.xlu1 %1272 }
 0x5fe   : > { %1282 = vst.msk [vmem:[#allocation2 + $0x41] sm:$0xff] %vm1278_vm8, %v1273_v11 }
 0x601   : > { %v1288_v15 = vpop.permute.xlu1 %1287 }
 0x602   : > { %1300 = vst.msk [vmem:[#allocation2 + $0x11] sm:$0xff] %vm1299_vm9, %v1288_v15 }
 0x605   : > { %v1290_v16 = vpop.permute.xlu1 %1289 }
 0x606   : > { %1301 = vst.msk [vmem:[#allocation2 + $0x21] sm:$0xff] %vm1299_vm9, %v1290_v16 }
 0x609   : > { %v1292_v23 = vpop.permute.xlu1 %1291 }
 0x60a   : > { %1302 = vst.msk [vmem:[#allocation2 + $0x31] sm:$0xff] %vm1299_vm9, %v1292_v23 }
 0x60d   : > { %v1294_v28 = vpop.permute.xlu1 %1293 }
 0x60e   : > { %1303 = vst.msk [vmem:[#allocation2 + $0x41] sm:$0xff] %vm1299_vm9, %v1294_v28 }
 0x60f PF: > { %v2517_v30 = vld [vmem:[%s4044_s0 + $0xc0] sm:$0xff]  ;;  %v2518_v36 = vld [vmem:[%s4044_s0 + $0xc8] sm:$0xff]  ;;  %v2519_v55 = vld [vmem:[%s4044_s0 + $0xd0] sm:$0xff]  ;;  %vm1327_vm10 = vcmask 523264   ;;  %p2618_p10 = scmp.ne.s32.totalorder %s3834_s7, 3 }
 0x610   : > { %v2557_v42 = vld [vmem:[%s4044_s0 + $0x100] sm:$0xff]  ;;  %v3165_v48 = vpack.c.bf16 %v2518_v36, %v2517_v30  ;;  %v2558_v50 = vld [vmem:[%s4044_s0 + $0x108] sm:$0xff]  ;;  %v2520_v60 = vld [vmem:[%s4044_s0 + $0xd8] sm:$0xff]  ;;  %s2290_s29 = sld [smem:[#allocation3]] (!%p2618_p10)  ;;  %vm2389_vm15 = vcmask (!%p2618_p10), 64512  }
 0x611   : > { %v3229_v62 = vpack.c.bf16 %v2558_v50, %v2557_v42  ;;  %v3169_v2 = vpack.c.bf16 %v2520_v60, %v2519_v55  ;;  %v2559_v4 = vld [vmem:[%s4044_s0 + $0x110] sm:$0xff]  ;;  %v2560_v9 = vld [vmem:[%s4044_s0 + $0x118] sm:$0xff]  ;;  %v2521_v10 = vld [vmem:[%s4044_s0 + $0xe0] sm:$0xff] }
 0x612   : > { %3166 = vmatprep.subr.bf16.mxu1 %v3165_v48  ;;  %v3233_v8 = vpack.c.bf16 %v2560_v9, %v2559_v4  ;;  %v2522_v12 = vld [vmem:[%s4044_s0 + $0xe8] sm:$0xff]  ;;  %v2561_v14 = vld [vmem:[%s4044_s0 + $0x120] sm:$0xff]  ;;  %v2523_v27 = vld [vmem:[%s4044_s0 + $0xf0] sm:$0xff] }
 0x613   : > { %v2562_v19 = vld [vmem:[%s4044_s0 + $0x128] sm:$0xff]  ;;  %3230 = vmatprep.subr.bf16.mxu0 %v3229_v62  ;;  %3168 = vmatpush3.bf16.msra.mxu1 %v3165_v48  ;;  %v3173_v20 = vpack.c.bf16 %v2522_v12, %v2521_v10  ;;  %v2524_v31 = vld [vmem:[%s4044_s0 + $0xf8] sm:$0xff]  ;;  %v2563_v17 = vld [vmem:[%s4044_s0 + $0x130] sm:$0xff] }
 0x614   : > { %3232 = vmatpush3.bf16.msra.mxu0 %v3229_v62  ;;  %3170 = vmatprep.subr.bf16.mxu1 %v3169_v2  ;;  %v4288_v24 = vld [vmem:[#allocation2 + $0x10] sm:$0xff]  ;;  %v3237_v26 = vpack.c.bf16 %v2562_v19, %v2561_v14  ;;  %v2564_v13 = vld [vmem:[%s4044_s0 + $0x138] sm:$0xff]  ;;  %v3177_v38 = vpack.c.bf16 %v2524_v31, %v2523_v27  ;;  %v1310_v21 = vld [vmem:[%s4044_s0] sm:$0xff] }
 0x615   : > { %3234 = vmatprep.subr.bf16.mxu0 %v3233_v8  ;;  %2761 = vmatprep.mubr.msk.f32.mxu1 %vm1327_vm10, %v4288_v24  ;;  %v4294_v35 = vld [vmem:[#allocation2 + $0x11] sm:$0xff]  ;;  %v3241_v18 = vpack.c.bf16 %v2564_v13, %v2563_v17  ;;  %v2569_v43 = vld [vmem:[%s4044_s0 + $0x1c0] sm:$0xff]  ;;  %v1313_v51 = vld [vmem:[%s4044_s0 + $0x18] sm:$0xff] }
 0x616   : > { %2849 = vmatprep.mubr.msk.f32.mxu0 %vm1327_vm10, %v4294_v35  ;;  %v1311_v40 = vld [vmem:[%s4044_s0 + $0x8] sm:$0xff]  ;;  %v1312_v39 = vld [vmem:[%s4044_s0 + $0x10] sm:$0xff]  ;;  %v2572_v54 = vld [vmem:[%s4044_s0 + $0x1d8] sm:$0xff] }
 0x617   : > { %3172 = vmatpush3.bf16.msra.mxu1 %v3169_v2  ;;  %v2570_v44 = vld [vmem:[%s4044_s0 + $0x1c8] sm:$0xff]  ;;  %v3181_v47 = vpack.c.bf16 %v1311_v40, %v1310_v21  ;;  %v2571_v52 = vld [vmem:[%s4044_s0 + $0x1d0] sm:$0xff]  ;;  %v4308_v56 = vld [vmem:[#allocation2 + $0x20] sm:$0xff]  ;;  %v3185_v63 = vpack.c.bf16 %v1313_v51, %v1312_v39 }
 0x618   : > { %3236 = vmatpush3.bf16.msra.mxu0 %v3233_v8  ;;  %3174 = vmatprep.subr.bf16.mxu1 %v3173_v20  ;;  %v3245_v32 = vpack.c.bf16 %v2570_v44, %v2569_v43  ;;  %v4310_v59 = vld [vmem:[#allocation2 + $0x21] sm:$0xff]  ;;  %v3249_v0 = vpack.c.bf16 %v2572_v54, %v2571_v52  ;;  %v1315_v22 = vld [vmem:[%s4044_s0 + $0x28] sm:$0xff]  ;;  %v1316_v46 = vld [vmem:[%s4044_s0 + $0x30] sm:$0xff] }
 0x619   : > { %3238 = vmatprep.subr.bf16.mxu0 %v3237_v26  ;;  %v1314_v3 = vld [vmem:[%s4044_s0 + $0x20] sm:$0xff]  ;;  %v2574_v29 = vld [vmem:[%s4044_s0 + $0x1e8] sm:$0xff]  ;;  %v1317_v49 = vld [vmem:[%s4044_s0 + $0x38] sm:$0xff] }
 0x61a   : > { %v2573_v25 = vld [vmem:[%s4044_s0 + $0x1e0] sm:$0xff]  ;;  %v4318_v33 = vld [vmem:[#allocation2 + $0x30] sm:$0xff]  ;;  %v3189_v37 = vpack.c.bf16 %v1315_v22, %v1314_v3  ;;  %v2576_v57 = vld [vmem:[%s4044_s0 + $0x1f8] sm:$0xff]  ;;  %v3193_v61 = vpack.c.bf16 %v1317_v49, %v1316_v46 }
 0x61b   : > { %3176 = vmatpush3.bf16.msra.mxu1 %v3173_v20  ;;  %v4322_v5 = vld [vmem:[#allocation2 + $0x31] sm:$0xff]  ;;  %v4324_v34 = vld [vmem:[#allocation2 + $0x40] sm:$0xff]  ;;  %v3253_v45 = vpack.c.bf16 %v2574_v29, %v2573_v25 }
 0x61c   : > { %3240 = vmatpush3.bf16.msra.mxu0 %v3237_v26  ;;  %3178 = vmatprep.subr.bf16.mxu1 %v3177_v38  ;;  %v1618_v41 = vld [vmem:[#allocation2 + $0x41] sm:$0xff]  ;;  %v2575_v53 = vld [vmem:[%s4044_s0 + $0x1f0] sm:$0xff]  ;;  %v2534_v7 = vld [vmem:[%s4044_s0 + $0x188] sm:$0xff] }
 0x61d   : > { %3242 = vmatprep.subr.bf16.mxu0 %v3241_v18  ;;  %v1304_v58 = vld [vmem:[#allocation2] sm:$0xff]  ;;  %v3257_v1 = vpack.c.bf16 %v2576_v57, %v2575_v53  ;;  %v2582_v15 = vld [vmem:[%s4044_s0 + $0x88] sm:$0xff]  ;;  %v2535_v28 = vld [vmem:[%s4044_s0 + $0x190] sm:$0xff] }
 0x61e   : > { %v2533_v6 = vld [vmem:[%s4044_s0 + $0x180] sm:$0xff]  ;;  %v2536_v30 = vld [vmem:[%s4044_s0 + $0x198] sm:$0xff]  ;;  %v2583_v36 = vld [vmem:[%s4044_s0 + $0x90] sm:$0xff] }
 0x61f   : > { %3180 = vmatpush3.bf16.msra.mxu1 %v3177_v38  ;;  %v2581_v11 = vld [vmem:[%s4044_s0 + $0x80] sm:$0xff]  ;;  %v3197_v16 = vpack.c.bf16 %v2534_v7, %v2533_v6  ;;  %v2584_v42 = vld [vmem:[%s4044_s0 + $0x98] sm:$0xff]  ;;  %v3201_v48 = vpack.c.bf16 %v2536_v30, %v2535_v28  ;;  %v2538_v60 = vld [vmem:[%s4044_s0 + $0x1a8] sm:$0xff] }
 0x620   : > { %3244 = vmatpush3.bf16.msra.mxu0 %v3241_v18  ;;  %3182 = vmatprep.subr.bf16.mxu1 %v3181_v47  ;;  %v3261_v23 = vpack.c.bf16 %v2582_v15, %v2581_v11  ;;  %v3265_v50 = vpack.c.bf16 %v2584_v42, %v2583_v36  ;;  %v2537_v55 = vld [vmem:[%s4044_s0 + $0x1a0] sm:$0xff]  ;;  %v2586_v2 = vld [vmem:[%s4044_s0 + $0xa8] sm:$0xff]  ;;  %v2539_v8 = vld [vmem:[%s4044_s0 + $0x1b0] sm:$0xff] }
 0x621   : > { %3246 = vmatprep.subr.bf16.mxu0 %v3245_v32  ;;  %v2585_v62 = vld [vmem:[%s4044_s0 + $0xa0] sm:$0xff]  ;;  %v3205_v4 = vpack.c.bf16 %v2538_v60, %v2537_v55  ;;  %v1619_v9 = vld [vmem:[#allocation2 + $0x51] sm:$0xff]  ;;  %v2540_v12 = vld [vmem:[%s4044_s0 + $0x1b8] sm:$0xff] }
 0x622   : > { %2762 = vmatmul.mubr.msk.f32.vlgmr.msra.gmra.mrb[0].mxu1 %vm1327_vm10, %v4308_v56  ;;  %v3269_v10 = vpack.c.bf16 %v2586_v2, %v2585_v62  ;;  %v2587_v14 = vld [vmem:[%s4044_s0 + $0xb0] sm:$0xff]  ;;  %v2588_v19 = vld [vmem:[%s4044_s0 + $0xb8] sm:$0xff]  ;;  %v2545_v27 = vld [vmem:[%s4044_s0 + $0x40] sm:$0xff] }
 0x623   : > { %3184 = vmatpush3.bf16.msra.mxu1 %v3181_v47  ;;  %2850 = vmatmul.mubr.msk.f32.vlgmr.msra.gmra.mrb[0].mxu0 %vm1327_vm10, %v4310_v59  ;;  %v1932_v20 = vld [vmem:[#allocation2 + $0x2] sm:$0xff]  ;;  %v3273_v26 = vpack.c.bf16 %v2588_v19, %v2587_v14  ;;  %v2546_v31 = vld [vmem:[%s4044_s0 + $0x48] sm:$0xff]  ;;  %v2547_v21 = vld [vmem:[%s4044_s0 + $0x50] sm:$0xff] }
 0x624   : > { %3248 = vmatpush3.bf16.msra.mxu0 %v3245_v32  ;;  %3186 = vmatprep.subr.bf16.mxu1 %v3185_v63  ;;  %v2593_v17 = vld [vmem:[%s4044_s0 + $0x140] sm:$0xff]  ;;  %v2594_v13 = vld [vmem:[%s4044_s0 + $0x148] sm:$0xff]  ;;  %v3213_v38 = vpack.c.bf16 %v2546_v31, %v2545_v27  ;;  %v2548_v40 = vld [vmem:[%s4044_s0 + $0x58] sm:$0xff] }
 0x625   : > { %3250 = vmatprep.subr.bf16.mxu0 %v3249_v0  ;;  %2764 = vmatprep.mubr.msk.f32.mxu1 %vm1327_vm10, %v4318_v33  ;;  %v3277_v18 = vpack.c.bf16 %v2594_v13, %v2593_v17  ;;  %v2595_v43 = vld [vmem:[%s4044_s0 + $0x150] sm:$0xff]  ;;  %v2596_v44 = vld [vmem:[%s4044_s0 + $0x158] sm:$0xff]  ;;  %v3217_v32 = vpack.c.bf16 %v2548_v40, %v2547_v21  ;;  %v2549_v51 = vld [vmem:[%s4044_s0 + $0x60] sm:$0xff] }
 0x626   : > { %2852 = vmatprep.mubr.msk.f32.mxu0 %vm1327_vm10, %v4322_v5  ;;  %2765 = vmatmul.mubr.msk.f32.gmra.mrb[2].mxu1 %vm1327_vm10, %v4324_v34  ;;  %v1933_v47 = vld [vmem:[#allocation2 + $0x12] sm:$0xff]  ;;  %v3281_v39 = vpack.c.bf16 %v2596_v44, %v2595_v43  ;;  %v2597_v54 = vld [vmem:[%s4044_s0 + $0x160] sm:$0xff]  ;;  %v2617_v60 = vld [vmem:[%s4050_s1] ss:$0 sm:$0xff] }
 0x627   : > { %3188 = vmatpush3.bf16.msra.mxu1 %v3185_v63  ;;  %2853 = vmatmul.mubr.msk.f32.gmra.mrb[2].mxu0 %vm1327_vm10, %v1618_v41  ;;  %v2550_v52 = vld [vmem:[%s4044_s0 + $0x68] sm:$0xff]  ;;  %v1934_v63 = vld [vmem:[#allocation2 + $0x22] sm:$0xff]  ;;  %v2551_v29 = vld [vmem:[%s4044_s0 + $0x70] sm:$0xff] }
 0x628   : > { %3252 = vmatpush3.bf16.msra.mxu0 %v3249_v0  ;;  %3190 = vmatprep.subr.bf16.mxu1 %v3189_v37  ;;  %v1309_v0 = vld [vmem:[#allocation2 + $0x50] sm:$0xff]  ;;  %v3221_v3 = vpack.c.bf16 %v2550_v52, %v2549_v51  ;;  %v2605_v49 = vld [vmem:[%s4044_s0 + $0x200] sm:$0xff] }
 0x629   : > { %3254 = vmatprep.subr.bf16.mxu0 %v3253_v45  ;;  %2783 = vmatprep.mubr.msk.f32.mxu1 %vm1327_vm10, %v1304_v58  ;;  %v4384_v22 = vld [vmem:[#allocation2 + $0x32] sm:$0xff]  ;;  %v2609_v6 = vld [vmem:[%s4044_s0 + $0x220] sm:$0xff] }
 0x62a   : > { %2871 = vmatprep.mubr.msk.f32.mxu0 %vm1327_vm10, %v4310_v59  ;;  %v2606_v53 = vld [vmem:[%s4044_s0 + $0x208] sm:$0xff]  ;;  %v2607_v58 = vld [vmem:[%s4044_s0 + $0x210] sm:$0xff]  ;;  %v1936_v11 = vld [vmem:[#allocation2 + $0x42] sm:$0xff] }
 0x62b   : > { %3192 = vmatpush3.bf16.msra.mxu1 %v3189_v37  ;;  %v2599_v37 = vld [vmem:[%s4044_s0 + $0x170] sm:$0xff]  ;;  %v3293_v57 = vpack.c.bf16 %v2606_v53, %v2605_v49  ;;  %v2610_v7 = vld [vmem:[%s4044_s0 + $0x228] sm:$0xff]  ;;  %v2282_v43 = vld [vmem:[%s4486_s6] sm:$0xff] (!%p2618_p10) }
 0x62c   : > { %3256 = vmatpush3.bf16.msra.mxu0 %v3253_v45  ;;  %3194 = vmatprep.subr.bf16.mxu1 %v3193_v61  ;;  %v1614_v45 = vld [vmem:[#allocation2 + $0x1] sm:$0xff]  ;;  %v3301_v15 = vpack.c.bf16 %v2610_v7, %v2609_v6 }
 0x62d   : > { %3258 = vmatprep.subr.bf16.mxu0 %v3257_v1  ;;  %v2283_v44 = vld [vmem:[%s4486_s6 + $0x8] sm:$0xff] (!%p2618_p10)  ;;  %v2286_v52 = vld [vmem:[%s4486_s6 + $0x20] sm:$0xff] (!%p2618_p10) }
 0x62f   : > { %3196 = vmatpush3.bf16.msra.mxu1 %v3193_v61  ;;  %v2608_v61 = vld [vmem:[%s4044_s0 + $0x218] sm:$0xff] }
 0x630   : > { %3260 = vmatpush3.bf16.msra.mxu0 %v3257_v1  ;;  %3198 = vmatprep.subr.bf16.mxu1 %v3197_v16  ;;  %v3297_v1 = vpack.c.bf16 %v2608_v61, %v2607_v58 }
 0x631   : > { %3262 = vmatprep.subr.bf16.mxu0 %v3261_v23 }
 0x632   : > { %2784 = vmatmul.mubr.msk.f32.vlgmr.msra.gmra.mrb[0].mxu1 %vm1327_vm10, %v4288_v24  ;;  %v3209_v24 = vpack.c.bf16 %v2540_v12, %v2539_v8 }
 0x633   : > { %3200 = vmatpush3.bf16.msra.mxu1 %v3197_v16  ;;  %2872 = vmatmul.mubr.msk.f32.vlgmr.msra.gmra.mrb[0].mxu0 %vm1327_vm10, %v4322_v5  ;;  %v2611_v16 = vld [vmem:[%s4044_s0 + $0x230] sm:$0xff] }
 0x634   : > { %3264 = vmatpush3.bf16.msra.mxu0 %v3261_v23  ;;  %3202 = vmatprep.subr.bf16.mxu1 %v3201_v48  ;;  %v2612_v23 = vld [vmem:[%s4044_s0 + $0x238] sm:$0xff] }
 0x635   : > { %3266 = vmatprep.subr.bf16.mxu0 %v3265_v50  ;;  %2786 = vmatprep.mubr.msk.f32.mxu1 %vm1327_vm10, %v4308_v56 }
 0x636   : > { %2874 = vmatprep.mubr.msk.f32.mxu0 %vm1327_vm10, %v1618_v41  ;;  %2787 = vmatmul.mubr.msk.f32.gmra.mrb[2].mxu1 %vm1327_vm10, %v4318_v33  ;;  %v2600_v41 = vld [vmem:[%s4044_s0 + $0x178] sm:$0xff] }
 0x637   : > { %3204 = vmatpush3.bf16.msra.mxu1 %v3201_v48  ;;  %2875 = vmatmul.mubr.msk.f32.gmra.mrb[2].mxu0 %vm1327_vm10, %v1619_v9  ;;  %v3289_v46 = vpack.c.bf16 %v2600_v41, %v2599_v37 }
 0x638   : > { %3268 = vmatpush3.bf16.msra.mxu0 %v3265_v50  ;;  %3206 = vmatprep.subr.bf16.mxu1 %v3205_v4 }
 0x639   : > { %3270 = vmatprep.subr.bf16.mxu0 %v3269_v10  ;;  %2805 = vmatprep.mubr.msk.f32.mxu1 %vm1327_vm10, %v4308_v56  ;;  %v2598_v56 = vld [vmem:[%s4044_s0 + $0x168] sm:$0xff] }
 0x63a   : > { %2893 = vmatprep.mubr.msk.f32.mxu0 %vm1327_vm10, %v1932_v20  ;;  %v3285_v25 = vpack.c.bf16 %v2598_v56, %v2597_v54  ;;  %v2287_v54 = vld [vmem:[%s4486_s6 + $0x28] sm:$0xff] (!%p2618_p10) }
 0x63b   : > { %3208 = vmatpush3.bf16.msra.mxu1 %v3205_v4  ;;  %v3317_v56 = vpack.c.bf16 (!%p2618_p10), %v2287_v54, %v2286_v52 }
 0x63c   : > { %3272 = vmatpush3.bf16.msra.mxu0 %v3269_v10  ;;  %3210 = vmatprep.subr.bf16.mxu1 %v3209_v24 }
 0x63d   : > { %3274 = vmatprep.subr.bf16.mxu0 %v3273_v26 }
 0x63f   : > { %3212 = vmatpush3.bf16.msra.mxu1 %v3209_v24 }
 0x640   : > { %3276 = vmatpush3.bf16.msra.mxu0 %v3273_v26  ;;  %3214 = vmatprep.subr.bf16.mxu1 %v3213_v38 }
 0x641   : > { %3278 = vmatprep.subr.bf16.mxu0 %v3277_v18 }
 0x642   : > { %2806 = vmatmul.mubr.msk.f32.vlgmr.msra.gmra.mrb[0].mxu1 %vm1327_vm10, %v4318_v33  ;;  %v2552_v33 = vld [vmem:[%s4044_s0 + $0x78] sm:$0xff] }
 0x643   : > { %3216 = vmatpush3.bf16.msra.mxu1 %v3213_v38  ;;  %2894 = vmatmul.mubr.msk.f32.vlgmr.msra.gmra.mrb[0].mxu0 %vm1327_vm10, %v1933_v47 }
 0x644   : > { %3280 = vmatpush3.bf16.msra.mxu0 %v3277_v18  ;;  %3218 = vmatprep.subr.bf16.mxu1 %v3217_v32 }
 0x645   : > { %3282 = vmatprep.subr.bf16.mxu0 %v3281_v39  ;;  %2808 = vmatprep.mubr.msk.f32.mxu1 %vm1327_vm10, %v4324_v34  ;;  %v3225_v34 = vpack.c.bf16 %v2552_v33, %v2551_v29 }
 0x646   : > { %2896 = vmatprep.mubr.msk.f32.mxu0 %vm1327_vm10, %v1934_v63  ;;  %2809 = vmatmul.mubr.msk.f32.gmra.mrb[2].mxu1 %vm1327_vm10, %v1309_v0  ;;  %v2289_v0 = vld [vmem:[%s4486_s6 + $0x38] sm:$0xff] (!%p2618_p10) }
 0x647   : > { %3220 = vmatpush3.bf16.msra.mxu1 %v3217_v32  ;;  %2897 = vmatmul.mubr.msk.f32.gmra.mrb[2].mxu0 %vm1327_vm10, %v4384_v22  ;;  %v3309_v32 = vpack.c.bf16 (!%p2618_p10), %v2283_v44, %v2282_v43 }
 0x648   : > { %3284 = vmatpush3.bf16.msra.mxu0 %v3281_v39  ;;  %3222 = vmatprep.subr.bf16.mxu1 %v3221_v3  ;;  %v2285_v39 = vld [vmem:[%s4486_s6 + $0x18] sm:$0xff] (!%p2618_p10) }
 0x649   : > { %3286 = vmatprep.subr.bf16.mxu0 %v3285_v25  ;;  %2827 = vmatprep.mubr.msk.f32.mxu1 %vm1327_vm10, %v1614_v45 }
 0x64a   : > { %2915 = vmatprep.mubr.msk.f32.mxu0 %vm1327_vm10, %v1933_v47  ;;  %v2284_v47 = vld [vmem:[%s4486_s6 + $0x10] sm:$0xff] (!%p2618_p10) }
 0x64b   : > { %3224 = vmatpush3.bf16.msra.mxu1 %v3221_v3  ;;  %v3313_v51 = vpack.c.bf16 (!%p2618_p10), %v2285_v39, %v2284_v47 }
 0x64c   : > { %3288 = vmatpush3.bf16.msra.mxu0 %v3285_v25  ;;  %3226 = vmatprep.subr.bf16.mxu1 %v3225_v34 }
 0x64d   : > { %3290 = vmatprep.subr.bf16.mxu0 %v3289_v46 }
 0x64f   : > { %3228 = vmatpush3.bf16.msra.mxu1 %v3225_v34 }
 0x650   : > { %3292 = vmatpush3.bf16.msra.mxu0 %v3289_v46  ;;  %3325 = vmatprep.subr.bf16.mxu1 %v3293_v57 }
 0x651   : > { %3294 = vmatprep.subr.bf16.mxu0 %v3293_v57 }
 0x652   : > { %2828 = vmatmul.mubr.msk.f32.vlgmr.msra.gmra.mrb[0].mxu1 %vm1327_vm10, %v4294_v35  ;;  %v3305_v35 = vpack.c.bf16 %v2612_v23, %v2611_v16 }
 0x653   : > { %2916 = vmatmul.mubr.msk.f32.vlgmr.msra.gmra.mrb[0].mxu0 %vm1327_vm10, %v1934_v63  ;;  %3329 = vmatpush3.bf16.msra.mxu1 %v3293_v57 }
 0x654   : > { %3296 = vmatpush3.bf16.msra.mxu0 %v3293_v57  ;;  %2830 = vmatprep.mubr.msk.f32.mxu1 %vm1327_vm10, %v4310_v59  ;;  %v1937_v59 = vld [vmem:[#allocation2 + $0x52] sm:$0xff] }
 0x655   : > { %2918 = vmatprep.mubr.msk.f32.mxu0 %vm1327_vm10, %v4384_v22  ;;  %3298 = vmatprep.subr.bf16.mxu0 %v3297_v1 }
 0x656   : > { %2831 = vmatmul.mubr.msk.f32.gmra.mrb[2].mxu1 %vm1327_vm10, %v4322_v5  ;;  %3326 = vmatprep.subr.bf16.mxu1 %v3297_v1 }
 0x657   : > { %2919 = vmatmul.mubr.msk.f32.gmra.mrb[2].mxu0 %vm1327_vm10, %v1936_v11  ;;  %3330 = vmatpush3.bf16.msra.mxu1 %v3297_v1 }
 0x658   : > { %3300 = vmatpush3.bf16.msra.mxu0 %v3297_v1  ;;  %3327 = vmatprep.subr.bf16.mxu1 %v3301_v15 }
 0x659   : > { %3302 = vmatprep.subr.bf16.mxu0 %v3301_v15  ;;  %2937 = vmatprep.mubr.msk.f32.mxu0 %vm1327_vm10, %v1934_v63  ;;  %v2288_v63 = vld [vmem:[%s4486_s6 + $0x30] sm:$0xff] (!%p2618_p10) }
 0x65a   : > { %2940 = vmatprep.mubr.msk.f32.mxu1 %vm1327_vm10, %v1936_v11  ;;  %v3321_v3 = vpack.c.bf16 (!%p2618_p10), %v2289_v0, %v2288_v63 }
 0x65b   : > { %3331 = vmatpush3.bf16.msra.mxu1 %v3301_v15 }
 0x65c   : > { %3304 = vmatpush3.bf16.msra.mxu0 %v3301_v15  ;;  %3328 = vmatprep.subr.bf16.mxu1 %v3305_v35 }
 0x65d   : > { %3306 = vmatprep.subr.bf16.mxu0 %v3305_v35 }
 0x65f   : > { %3332 = vmatpush3.bf16.msra.mxu1 %v3305_v35 }
 0x660   : > { %3308 = vmatpush3.bf16.msra.mxu0 %v3305_v35  ;;  %3365 = vmatprep.subr.bf16.mxu1 (!%p2618_p10), %v3309_v32 }
 0x661   : > { %3310 = vmatprep.subr.bf16.mxu0 (!%p2618_p10), %v3309_v32 }
 0x662   : > { %2941 = vmatmul.mubr.msk.f32.vlgmr.msra.gmra.mrb[4].mxu1 %vm1327_vm10, %v1937_v59 }
 0x663   : > { %2938 = vmatmul.mubr.msk.f32.vlgmr.msra.gmra.mrb[0].mxu0 %vm1327_vm10, %v4384_v22  ;;  %3369 = vmatpush3.bf16.msra.mxu1 (!%p2618_p10), %v3309_v32  ;;  %v2291_v22 = vstv (!%p2618_p10), %s2290_s29 }
 0x664   : > { %3312 = vmatpush3.bf16.msra.mxu0 (!%p2618_p10), %v3309_v32  ;;  %3366 = vmatprep.subr.bf16.mxu1 (!%p2618_p10), %v3313_v51 }
 0x665   : > { %3314 = vmatprep.subr.bf16.mxu0 (!%p2618_p10), %v3313_v51 }
 0x667   : > { %3370 = vmatpush3.bf16.msra.mxu1 (!%p2618_p10), %v3313_v51 }
 0x668   : > { %3316 = vmatpush3.bf16.msra.mxu0 (!%p2618_p10), %v3313_v51  ;;  %3367 = vmatprep.subr.bf16.mxu1 (!%p2618_p10), %v3317_v56 }
 0x669   : > { %3318 = vmatprep.subr.bf16.mxu0 (!%p2618_p10), %v3317_v56 }
 0x66b   : > { %3371 = vmatpush3.bf16.msra.mxu1 (!%p2618_p10), %v3317_v56 }
 0x66c   : > { %3320 = vmatpush3.bf16.msra.mxu0 (!%p2618_p10), %v3317_v56  ;;  %3368 = vmatprep.subr.bf16.mxu1 (!%p2618_p10), %v3321_v3 }
 0x66d   : > { %3322 = vmatprep.subr.bf16.mxu0 (!%p2618_p10), %v3321_v3 }
 0x66f   : > { %3372 = vmatpush3.bf16.msra.mxu1 (!%p2618_p10), %v3321_v3 }
 0x670   : > { %3324 = vmatpush3.bf16.msra.mxu0 (!%p2618_p10), %v3321_v3 }
 0x725   : > { %v2829_v5 = vpop.f32.mrb[0].mxu1 }
 0x726   : > { %v1707_v28 = vpop.f32.mrb[1].mxu1 }
 0x729   : > { %v2832_v30 = vpop.f32.mrb[2].mxu1 }
 0x72a   : > { %v2920_v36 = vpop.f32.mrb[2].mxu0  ;;  %v1717_v42 = vpop.f32.mrb[3].mxu1 }
 0x72b   : > { %v3335_v48 = vadd.f32 %v2920_v36, %v2832_v30  ;;  %v2136_v50 = vpop.f32.mrb[3].mxu0 }
 0x72c   : > { %v3337_v55 = vadd.f32 %v2136_v50, %v1717_v42 }
 0x735   : > { %v2942_v62 = vpop.f32.mrb[4].mxu1 }
 0x736   : > { %v2939_v2 = vpop.f32.mrb[0].mxu0  ;;  %v3336_v4 = vadd.f32 %v3335_v48, %v2942_v62  ;;  %v2237_v9 = vpop.f32.mrb[5].mxu1 }
 0x737   : > { %v3333_v10 = vadd.f32 %v2939_v2, %v2829_v5  ;;  %v2227_v8 = vpop.f32.mrb[1].mxu0  ;;  %v3338_v12 = vadd.f32 %v3337_v55, %v2237_v9 }
 0x738   : > { %v2260_v14 = vadd.f32 %v3336_v4, %v2617_v60  ;;  %v3334_v19 = vadd.f32 %v2227_v8, %v1707_v28 }
 0x739   : > { %v2258_v20 = vadd.f32 %v3333_v10, %v2617_v60  ;;  %v2259_v24 = vadd.f32 %v3338_v12, %v2617_v60  ;;  %2281 = sbr.rel (%p2618_p10) target bundleno = 2072 (0x818), region = 84 }
 0x73a   : > { %vm2264_vm11 = vcmp.gt.f32.partialorder %v2260_v14, 0.0  ;;  %v2268_v26 = vmul.f32 0.1, %v2260_v14  ;;  %v2257_v27 = vadd.f32 %v3334_v19, %v2617_v60 }
 0x73b   : > { %vm2262_vm12 = vcmp.gt.f32.partialorder %v2258_v20, 0.0  ;;  %v2266_v31 = vmul.f32 0.1, %v2258_v20  ;;  %vm2263_vm13 = vcmp.gt.f32.partialorder %v2259_v24, 0.0  ;;  %v2267_v17 = vmul.f32 0.1, %v2259_v24 }
 0x73c   : > { %v2272_v13 = vsel %vm2264_vm11, %v2260_v14, %v2268_v26  ;;  %vm2261_vm14 = vcmp.gt.f32.partialorder %v2257_v27, 0.0  ;;  %v2265_v38 = vmul.f32 0.1, %v2257_v27 }
 0x73d   : > { %v2270_v18 = vsel %vm2262_vm12, %v2258_v20, %v2266_v31  ;;  %2277 = vst.msk [vmem:[#allocation2 + $0x41] sm:$0xff] %vm1327_vm10, %v2272_v13  ;;  %v2271_v21 = vsel %vm2263_vm13, %v2259_v24, %v2267_v17 }
 0x73e   : > { %2275 = vst.msk [vmem:[#allocation2 + $0x21] sm:$0xff] %vm1327_vm10, %v2270_v18  ;;  %v2269_v40 = vsel %vm2261_vm14, %v2257_v27, %v2265_v38  ;;  %2276 = vst.msk [vmem:[#allocation2 + $0x31] sm:$0xff] %vm1327_vm10, %v2271_v21  ;;  %2962 = vmatprep.mubr.msk.f32.mxu1 (!%p2618_p10), %vm1327_vm10, %v2271_v21 }
 0x73f   : > { %2274 = vst.msk [vmem:[#allocation2 + $0x11] sm:$0xff] %vm1327_vm10, %v2269_v40  ;;  %2959 = vmatprep.mubr.msk.f32.mxu0 (!%p2618_p10), %vm1327_vm10, %v2269_v40  ;;  %2963 = vmatmul.mubr.msk.f32.vlgmr.msra.gmra.mrb[0].mxu1 (!%p2618_p10), %vm1327_vm10, %v2272_v13 }
 0x740   : > { %2960 = vmatmul.mubr.msk.f32.vlgmr.msra.gmra.mrb[0].mxu0 %vm1327_vm10, %v2270_v18 }
 0x812   : > { %v2964_v29 = vpop.f32.mrb[0].mxu1 }
 0x813   : > { %v2961_v25 = vpop.f32.mrb[0].mxu0  ;;  %v2386_v37 = vadd.f32 %v2964_v29, %v2291_v22  ;;  %v2380_v45 = vpop.f32.mrb[1].mxu1 }
 0x814   : > { %v2376_v33 = vadd.f32 %v2961_v25, %v2291_v22  ;;  %v2370_v41 = vpop.f32.mrb[1].mxu0  ;;  %v2381_v46 = vadd.f32 %v2380_v45, %v2291_v22 }
 0x815   : > { %v2371_v34 = vadd.f32 %v2370_v41, %v2291_v22  ;;  %2393 = vst.msk [vmem:[%s4488_s8 + $0x18] sm:$0xff] %vm2389_vm15, %v2386_v37 }
 0x816   : > { %2391 = vst.msk [vmem:[%s4488_s8 + $0x8] sm:$0xff] %vm2389_vm15, %v2376_v33  ;;  %2392 = vst.msk [vmem:[%s4488_s8 + $0x10] sm:$0xff] %vm2389_vm15, %v2381_v46 }
 0x817   : > { %2390 = vst.msk [vmem:[%s4488_s8] sm:$0xff] %vm2389_vm15, %v2371_v34 }
 0x818 PF: > { %s4528_s24 = sld [smem:[#allocation17_spill]]  ;;  %p19_p2 = scmp.ge.s32.totalorder %s3912_s27, 6  }
 0x819   : > { %s4529_s29 = smov %s3743_s30  ;;  %s4530_s30 = smov %s3747_s9 }
 0x81a   : > { %s4532_s10 = smov %s3912_s27  ;;  %21 = sbr.rel (!%p19_p2) target bundleno = 9 (0x9), region = 132 }
 0x81e   : > { %s4531_s9 = smov %s4528_s24 }
 0x821   :  { %2405 = vsyncpa [#allocation5], 1 }
 0x822   :  { %2407 = vsyncpa [#allocation5 + $0x1], 1 }
 0x823   :  { %2408 = vsyncpa [#allocation7], 1 }
 0x824   :  { %2409 = vsyncpa [#allocation10], 1 }

</bundles_post_ra>
